<compile_context>
chip_gen: v6e
topology: v6e:2x2x1
jax: 0.10.0
libtpu: 0.0.40
codegen_flags: <defaults>
</compile_context>

<pallas_src>
import jax
import jax.numpy as jnp
from jax import lax
from jax.experimental import pallas as pl
from jax.experimental.pallas import tpu as pltpu

# ---- shapes -----------------------------------------------------------------
B, CIN, H, W = 2, 3, 16, 16       # batch 2, RGB 16x16 image (NCHW at the API)
CMID = 8                          # stand-in backbone conv channels
FEAT = 1000                       # resnet34 feature width (folded away)
NCLS = 4                          # Linear(1000 -> 4)
LANES = 128                       # output slab lane width

# Flat "canvas" layout: each image sits at offset (1,1) inside a 32x32 zero
# canvas, so a 3x3 / pad=1 conv tap (dy,dx) is just a flat lane shift of
# s = dy*32 + dx.  Power-of-two per-image length -> validity masks need only
# shifts/ands (no vector integer division).
CW = 32                           # canvas side (power of two >= H+2)
QPB = CW * CW                     # flat positions per image (1024)
NQ = B * QPB                      # total flat positions (2048)
XLEN = NQ + LANES                 # slack so every tap slice stays in bounds


# ---- fused kernel -----------------------------------------------------------
def double_loss_kernel(xflat_ref, wcol_ref, bconv_ref,
                       wf_ref, bf_ref, w2_ref, b2_ref, out_ref):
    # -- stand-in backbone: 3x3 conv as 9 shifted-slice matmuls + bias + ReLU --
    # (bf16 operands, f32 accumulation; result is (CMID, NQ): 8 sublanes x
    #  2048 dense lanes.)
    acc = None
    for t in range(9):                                   # static, unrolled
        dy, dx = t // 3, t % 3
        s = dy * CW + dx
        xs = xflat_ref[:, s:s + NQ]                      # (CIN, NQ)   bf16
        wt = wcol_ref[:, t * CIN:(t + 1) * CIN]          # (CMID, CIN) bf16
        d = jnp.dot(wt, xs, preferred_element_type=jnp.float32)
        acc = d if acc is None else acc + d
    conv = jnp.maximum(acc + bconv_ref[...], 0.0)        # (CMID, NQ) f32

    # -- global average pool over each image's valid 16x16 window --------------
    # Pool-selection matrix built in-registers from iota; contraction runs with
    # the long axis on lanes (A @ B^T), no HBM pool constant.
    q = lax.broadcasted_iota(jnp.int32, (8, NQ), 1)
    r = lax.broadcasted_iota(jnp.int32, (8, NQ), 0)
    b_of = q >> 10                                       # q // QPB
    hh = (q >> 5) & (CW - 1)
    ww = q & (CW - 1)
    valid = (b_of == r) & (hh < H) & (ww < W)
    poolmat = jnp.where(valid, 1.0 / float(H * W), 0.0)  # (8, NQ) f32
    pooled = lax.dot_general(                            # (8, CMID); rows>=B are 0
        poolmat, conv, (((1,), (1,)), ((), ())),
        preferred_element_type=jnp.float32)

    # -- head: folded Linear(1000->4) -> softmax ; ReLU -> Linear(4->1) -> sigmoid
    # wfc/bfc/w1/b1 were folded at trace time into wf/bf (zero lane-padded to 128).
    out0 = jnp.dot(pooled, wf_ref[...],
                   preferred_element_type=jnp.float32) + bf_ref[...]   # (8, 128)

    lane = lax.broadcasted_iota(jnp.int32, (8, LANES), 1)
    is_cls = lane < NCLS

    # softmax over the 4 class lanes (nn.Softmax() picks dim=1 for 2-D input)
    m = jnp.max(out0, axis=1, keepdims=True)             # >= max over class lanes
    e = jnp.where(is_cls, jnp.exp(out0 - m), 0.0)
    soft = e * pl.reciprocal(jnp.sum(e, axis=1, keepdims=True), approx=True)

    # block2: ReLU -> Linear(4,1) (as a masked lane-reduce) -> Sigmoid
    relu = jnp.maximum(out0, 0.0)
    z = jnp.sum(relu * w2_ref[...], axis=1, keepdims=True) + b2_ref[...]  # (8, 1)
    sig = pl.reciprocal(1.0 + jnp.exp(-z), approx=True)

    # single dense (8, 128) store: lanes [0,4) = softmax, lane 4 = sigmoid
    out_ref[...] = jnp.where(is_cls, soft, jnp.where(lane == NCLS, sig, 0.0))


# ---- wrapper: layout glue + pallas_call --------------------------------------
@jax.jit
def double_loss_forward(x_nchw, params):
    # Fold the FC chain (valid because Dropout == identity and there is no
    # nonlinearity between the two Linears), then zero-pad to 128 lanes.
    w_fused = params["wfc"] @ params["w1"]                      # (CMID, NCLS)
    b_fused = params["bfc"] @ params["w1"] + params["b1"]       # (1, NCLS)
    wf = jnp.zeros((CMID, LANES), jnp.float32).at[:, :NCLS].set(w_fused)
    bf = jnp.zeros((1, LANES), jnp.float32).at[:, :NCLS].set(b_fused)
    w2 = jnp.zeros((1, LANES), jnp.float32).at[:, :NCLS].set(params["w2"][:, 0])
    b2 = params["b2"].reshape(1, 1).astype(jnp.float32)

    # Pack the image into the flat canvas layout (bf16 for the MXU inputs).
    xt = jnp.transpose(x_nchw.astype(jnp.float32), (1, 0, 2, 3))       # (CIN,B,H,W)
    canvas = jnp.pad(xt, ((0, 0), (0, 0), (1, CW - H - 1), (1, CW - W - 1)))
    xflat = jnp.pad(canvas.reshape(CIN, NQ), ((0, 0), (0, LANES)))
    xflat = xflat.astype(jnp.bfloat16)                                 # (CIN, XLEN)
    wcol = params["wcol"].T.astype(jnp.bfloat16)                       # (CMID, 27)
    bconv = params["bconv"].reshape(CMID, 1).astype(jnp.float32)

    vmem = pl.BlockSpec(memory_space=pltpu.MemorySpace.VMEM)
    slab = pl.pallas_call(
        double_loss_kernel,
        out_shape=jax.ShapeDtypeStruct((8, LANES), jnp.float32),
        in_specs=[vmem] * 7,
        out_specs=vmem,
    )(xflat, wcol, bconv, wf, bf, w2, b2)

    soft = slab[:B, :NCLS]
    out1 = slab[:B, NCLS:NCLS + 1]
    return soft, out1


# ---- deterministic parameter init --------------------------------------------
def init_params(key):
    ks = jax.random.split(key, 8)

    def uni(k, shape, fan_in):
        bound = 1.0 / jnp.sqrt(float(fan_in))
        return jax.random.uniform(k, shape, jnp.float32, -bound, bound)

    wconv = uni(ks[0], (3, 3, CIN, CMID), 9 * CIN)        # conv3x3 weights (HWIO)
    return {
        "wcol":  wconv.reshape(9 * CIN, CMID),            # row = dy*3*CIN+dx*CIN+c
        "bconv": uni(ks[1], (1, CMID), 9 * CIN),
        "wfc":   uni(ks[2], (CMID, FEAT), CMID),
        "bfc":   uni(ks[3], (1, FEAT), CMID),
        "w1":    uni(ks[4], (FEAT, NCLS), FEAT),           # Linear(1000, 4)
        "b1":    uni(ks[5], (1, NCLS), FEAT),
        "w2":    uni(ks[6], (NCLS, 1), NCLS),              # Linear(4, 1)
        "b2":    uni(ks[7], (1, 1), NCLS),
    }


# ---- pure-JAX reference: UNfused math (validates the fold, the conv trick,
#      the iota pooling mask and the output packing) ----------------------------
def reference_forward(x_nchw, params):
    x = jnp.transpose(x_nchw, (0, 2, 3, 1)).astype(jnp.float32)        # NHWC
    xpad = jnp.pad(x, ((0, 0), (1, 1), (1, 1), (0, 0)))
    cols = []
    for dy in range(3):
        for dx in range(3):
            cols.append(xpad[:, dy:dy + H, dx:dx + W, :])
    patches = jnp.concatenate(cols, axis=-1).reshape(B * H * W, 9 * CIN)
    conv = jnp.dot(patches.astype(jnp.bfloat16),
                   params["wcol"].astype(jnp.bfloat16),
                   preferred_element_type=jnp.float32) + params["bconv"]
    conv = jnp.maximum(conv, 0.0)                                      # (BHW, CMID)
    pooled = conv.reshape(B, H * W, CMID).mean(axis=1)                 # (B, CMID)
    feat = pooled @ params["wfc"] + params["bfc"]                      # (B, 1000)
    out0 = feat @ params["w1"] + params["b1"]                          # (B, 4)
    soft = jax.nn.softmax(out0, axis=1)
    out1 = jax.nn.sigmoid(jnp.maximum(out0, 0.0) @ params["w2"] + params["b2"])
    return soft, out1


if __name__ == "__main__":
    key = jax.random.PRNGKey(0)
    k_x, k_p = jax.random.split(key)
    x = jax.random.normal(k_x, (B, CIN, H, W), jnp.float32)   # NCHW, like PyTorch
    params = init_params(k_p)

    soft, out1 = double_loss_forward(x, params)
    jax.block_until_ready((soft, out1))

    ref_soft, ref_out1 = reference_forward(x, params)
    assert soft.shape == (B, NCLS) and out1.shape == (B, 1)
    # tolerances cover bf16 MXU inputs + approximate EUP reciprocal
    assert jnp.allclose(soft, ref_soft, atol=3e-3, rtol=3e-3)
    assert jnp.allclose(out1, ref_out1, atol=3e-3, rtol=3e-3)
    assert jnp.allclose(jnp.sum(soft, axis=1), 1.0, atol=3e-3)

    print("KERNEL_OK")
</pallas_src>

<mosaic_0001>
module attributes {stable_mosaic.version = 11 : i64} {
  func.func @double_loss_kernel(%arg0: memref<3x2176xbf16, #tpu.memory_space<vmem>>, %arg1: memref<8x27xbf16, #tpu.memory_space<vmem>>, %arg2: memref<8x1xf32, #tpu.memory_space<vmem>>, %arg3: memref<8x128xf32, #tpu.memory_space<vmem>>, %arg4: memref<1x128xf32, #tpu.memory_space<vmem>>, %arg5: memref<1x128xf32, #tpu.memory_space<vmem>>, %arg6: memref<1x1xf32, #tpu.memory_space<vmem>>, %arg7: memref<8x128xf32, #tpu.memory_space<vmem>>) attributes {dimension_semantics = [], scalar_prefetch = 0 : i64, scratch_operands = 0 : i64, tpu.core_type = #tpu.core_type<tc>} {
    %c0 = arith.constant 0 : index
    %c0_0 = arith.constant 0 : index
    %0 = vector.load %arg0[%c0, %c0_0] : memref<3x2176xbf16, #tpu.memory_space<vmem>>, vector<3x2048xbf16>
    %c0_1 = arith.constant 0 : index
    %c0_2 = arith.constant 0 : index
    %1 = vector.load %arg1[%c0_1, %c0_2] : memref<8x27xbf16, #tpu.memory_space<vmem>>, vector<8x3xbf16>
    %cst = arith.constant dense<0.000000e+00> : vector<8x2048xf32>
    %2 = tpu.matmul %1, %0, %cst {dimension_numbers = #tpu.dot_dimension_numbers<[1], [0], [0], [1], [0, 0, 1, 1], [], []>} : vector<8x3xbf16>, vector<3x2048xbf16>, vector<8x2048xf32> -> vector<8x2048xf32>
    %c0_3 = arith.constant 0 : index
    %c1 = arith.constant 1 : index
    %3 = vector.load %arg0[%c0_3, %c1] : memref<3x2176xbf16, #tpu.memory_space<vmem>>, vector<3x2048xbf16>
    %c0_4 = arith.constant 0 : index
    %c3 = arith.constant 3 : index
    %4 = vector.load %arg1[%c0_4, %c3] : memref<8x27xbf16, #tpu.memory_space<vmem>>, vector<8x3xbf16>
    %cst_5 = arith.constant dense<0.000000e+00> : vector<8x2048xf32>
    %5 = tpu.matmul %4, %3, %cst_5 {dimension_numbers = #tpu.dot_dimension_numbers<[1], [0], [0], [1], [0, 0, 1, 1], [], []>} : vector<8x3xbf16>, vector<3x2048xbf16>, vector<8x2048xf32> -> vector<8x2048xf32>
    %6 = arith.addf %2, %5 : vector<8x2048xf32>
    %c0_6 = arith.constant 0 : index
    %c2 = arith.constant 2 : index
    %7 = vector.load %arg0[%c0_6, %c2] : memref<3x2176xbf16, #tpu.memory_space<vmem>>, vector<3x2048xbf16>
    %c0_7 = arith.constant 0 : index
    %c6 = arith.constant 6 : index
    %8 = vector.load %arg1[%c0_7, %c6] : memref<8x27xbf16, #tpu.memory_space<vmem>>, vector<8x3xbf16>
    %cst_8 = arith.constant dense<0.000000e+00> : vector<8x2048xf32>
    %9 = tpu.matmul %8, %7, %cst_8 {dimension_numbers = #tpu.dot_dimension_numbers<[1], [0], [0], [1], [0, 0, 1, 1], [], []>} : vector<8x3xbf16>, vector<3x2048xbf16>, vector<8x2048xf32> -> vector<8x2048xf32>
    %10 = arith.addf %6, %9 : vector<8x2048xf32>
    %c0_9 = arith.constant 0 : index
    %c32 = arith.constant 32 : index
    %11 = vector.load %arg0[%c0_9, %c32] : memref<3x2176xbf16, #tpu.memory_space<vmem>>, vector<3x2048xbf16>
    %c0_10 = arith.constant 0 : index
    %c9 = arith.constant 9 : index
    %12 = vector.load %arg1[%c0_10, %c9] : memref<8x27xbf16, #tpu.memory_space<vmem>>, vector<8x3xbf16>
    %cst_11 = arith.constant dense<0.000000e+00> : vector<8x2048xf32>
    %13 = tpu.matmul %12, %11, %cst_11 {dimension_numbers = #tpu.dot_dimension_numbers<[1], [0], [0], [1], [0, 0, 1, 1], [], []>} : vector<8x3xbf16>, vector<3x2048xbf16>, vector<8x2048xf32> -> vector<8x2048xf32>
    %14 = arith.addf %10, %13 : vector<8x2048xf32>
    %c0_12 = arith.constant 0 : index
    %c33 = arith.constant 33 : index
    %15 = vector.load %arg0[%c0_12, %c33] : memref<3x2176xbf16, #tpu.memory_space<vmem>>, vector<3x2048xbf16>
    %c0_13 = arith.constant 0 : index
    %c12 = arith.constant 12 : index
    %16 = vector.load %arg1[%c0_13, %c12] : memref<8x27xbf16, #tpu.memory_space<vmem>>, vector<8x3xbf16>
    %cst_14 = arith.constant dense<0.000000e+00> : vector<8x2048xf32>
    %17 = tpu.matmul %16, %15, %cst_14 {dimension_numbers = #tpu.dot_dimension_numbers<[1], [0], [0], [1], [0, 0, 1, 1], [], []>} : vector<8x3xbf16>, vector<3x2048xbf16>, vector<8x2048xf32> -> vector<8x2048xf32>
    %18 = arith.addf %14, %17 : vector<8x2048xf32>
    %c0_15 = arith.constant 0 : index
    %c34 = arith.constant 34 : index
    %19 = vector.load %arg0[%c0_15, %c34] : memref<3x2176xbf16, #tpu.memory_space<vmem>>, vector<3x2048xbf16>
    %c0_16 = arith.constant 0 : index
    %c15 = arith.constant 15 : index
    %20 = vector.load %arg1[%c0_16, %c15] : memref<8x27xbf16, #tpu.memory_space<vmem>>, vector<8x3xbf16>
    %cst_17 = arith.constant dense<0.000000e+00> : vector<8x2048xf32>
    %21 = tpu.matmul %20, %19, %cst_17 {dimension_numbers = #tpu.dot_dimension_numbers<[1], [0], [0], [1], [0, 0, 1, 1], [], []>} : vector<8x3xbf16>, vector<3x2048xbf16>, vector<8x2048xf32> -> vector<8x2048xf32>
    %22 = arith.addf %18, %21 : vector<8x2048xf32>
    %c0_18 = arith.constant 0 : index
    %c64 = arith.constant 64 : index
    %23 = vector.load %arg0[%c0_18, %c64] : memref<3x2176xbf16, #tpu.memory_space<vmem>>, vector<3x2048xbf16>
    %c0_19 = arith.constant 0 : index
    %c18 = arith.constant 18 : index
    %24 = vector.load %arg1[%c0_19, %c18] : memref<8x27xbf16, #tpu.memory_space<vmem>>, vector<8x3xbf16>
    %cst_20 = arith.constant dense<0.000000e+00> : vector<8x2048xf32>
    %25 = tpu.matmul %24, %23, %cst_20 {dimension_numbers = #tpu.dot_dimension_numbers<[1], [0], [0], [1], [0, 0, 1, 1], [], []>} : vector<8x3xbf16>, vector<3x2048xbf16>, vector<8x2048xf32> -> vector<8x2048xf32>
    %26 = arith.addf %22, %25 : vector<8x2048xf32>
    %c0_21 = arith.constant 0 : index
    %c65 = arith.constant 65 : index
    %27 = vector.load %arg0[%c0_21, %c65] : memref<3x2176xbf16, #tpu.memory_space<vmem>>, vector<3x2048xbf16>
    %c0_22 = arith.constant 0 : index
    %c21 = arith.constant 21 : index
    %28 = vector.load %arg1[%c0_22, %c21] : memref<8x27xbf16, #tpu.memory_space<vmem>>, vector<8x3xbf16>
    %cst_23 = arith.constant dense<0.000000e+00> : vector<8x2048xf32>
    %29 = tpu.matmul %28, %27, %cst_23 {dimension_numbers = #tpu.dot_dimension_numbers<[1], [0], [0], [1], [0, 0, 1, 1], [], []>} : vector<8x3xbf16>, vector<3x2048xbf16>, vector<8x2048xf32> -> vector<8x2048xf32>
    %30 = arith.addf %26, %29 : vector<8x2048xf32>
    %c0_24 = arith.constant 0 : index
    %c66 = arith.constant 66 : index
    %31 = vector.load %arg0[%c0_24, %c66] : memref<3x2176xbf16, #tpu.memory_space<vmem>>, vector<3x2048xbf16>
    %c0_25 = arith.constant 0 : index
    %c24 = arith.constant 24 : index
    %32 = vector.load %arg1[%c0_25, %c24] : memref<8x27xbf16, #tpu.memory_space<vmem>>, vector<8x3xbf16>
    %cst_26 = arith.constant dense<0.000000e+00> : vector<8x2048xf32>
    %33 = tpu.matmul %32, %31, %cst_26 {dimension_numbers = #tpu.dot_dimension_numbers<[1], [0], [0], [1], [0, 0, 1, 1], [], []>} : vector<8x3xbf16>, vector<3x2048xbf16>, vector<8x2048xf32> -> vector<8x2048xf32>
    %34 = arith.addf %30, %33 : vector<8x2048xf32>
    %c0_27 = arith.constant 0 : index
    %c0_28 = arith.constant 0 : index
    %35 = vector.load %arg2[%c0_27, %c0_28] : memref<8x1xf32, #tpu.memory_space<vmem>>, vector<8x1xf32>
    %36 = vector.broadcast %35 : vector<8x1xf32> to vector<8x2048xf32>
    %37 = arith.addf %34, %36 : vector<8x2048xf32>
    %cst_29 = arith.constant 0.000000e+00 : f32
    %38 = vector.broadcast %cst_29 : f32 to vector<8x2048xf32>
    %39 = arith.maximumf %37, %38 : vector<8x2048xf32>
    %40 = tpu.iota {dimensions = array<i32: 1>} : vector<8x2048xi32>
    %41 = tpu.iota {dimensions = array<i32: 0>} : vector<8x2048xi32>
    %c10_i32 = arith.constant 10 : i32
    %42 = vector.broadcast %c10_i32 : i32 to vector<8x2048xi32>
    %43 = arith.shrsi %40, %42 : vector<8x2048xi32>
    %c5_i32 = arith.constant 5 : i32
    %44 = vector.broadcast %c5_i32 : i32 to vector<8x2048xi32>
    %45 = arith.shrsi %40, %44 : vector<8x2048xi32>
    %c31_i32 = arith.constant 31 : i32
    %46 = vector.broadcast %c31_i32 : i32 to vector<8x2048xi32>
    %47 = arith.andi %45, %46 : vector<8x2048xi32>
    %c31_i32_30 = arith.constant 31 : i32
    %48 = vector.broadcast %c31_i32_30 : i32 to vector<8x2048xi32>
    %49 = arith.andi %40, %48 : vector<8x2048xi32>
    %50 = arith.cmpi eq, %43, %41 : vector<8x2048xi32>
    %c16_i32 = arith.constant 16 : i32
    %51 = vector.broadcast %c16_i32 : i32 to vector<8x2048xi32>
    %52 = arith.cmpi slt, %47, %51 : vector<8x2048xi32>
    %53 = arith.andi %50, %52 : vector<8x2048xi1>
    %c16_i32_31 = arith.constant 16 : i32
    %54 = vector.broadcast %c16_i32_31 : i32 to vector<8x2048xi32>
    %55 = arith.cmpi slt, %49, %54 : vector<8x2048xi32>
    %56 = arith.andi %53, %55 : vector<8x2048xi1>
    %cst_32 = arith.constant 3.906250e-03 : f32
    %cst_33 = arith.constant 0.000000e+00 : f32
    %57 = vector.broadcast %cst_32 : f32 to vector<8x2048xf32>
    %58 = vector.broadcast %cst_33 : f32 to vector<8x2048xf32>
    %59 = arith.select %56, %57, %58 : vector<8x2048xi1>, vector<8x2048xf32>
    %cst_34 = arith.constant dense<0.000000e+00> : vector<8x8xf32>
    %60 = tpu.matmul %59, %39, %cst_34 {dimension_numbers = #tpu.dot_dimension_numbers<[1], [1], [0], [0], [0, 0, 1, 0], [], []>} : vector<8x2048xf32>, vector<8x2048xf32>, vector<8x8xf32> -> vector<8x8xf32>
    %c0_35 = arith.constant 0 : index
    %c0_36 = arith.constant 0 : index
    %61 = vector.load %arg3[%c0_35, %c0_36] : memref<8x128xf32, #tpu.memory_space<vmem>>, vector<8x128xf32>
    %cst_37 = arith.constant dense<0.000000e+00> : vector<8x128xf32>
    %62 = tpu.matmul %60, %61, %cst_37 {dimension_numbers = #tpu.dot_dimension_numbers<[1], [0], [0], [1], [0, 0, 1, 1], [], []>} : vector<8x8xf32>, vector<8x128xf32>, vector<8x128xf32> -> vector<8x128xf32>
    %c0_38 = arith.constant 0 : index
    %c0_39 = arith.constant 0 : index
    %63 = vector.load %arg4[%c0_38, %c0_39] : memref<1x128xf32, #tpu.memory_space<vmem>>, vector<1x128xf32>
    %64 = vector.broadcast %63 : vector<1x128xf32> to vector<8x128xf32>
    %65 = arith.addf %62, %64 : vector<8x128xf32>
    %66 = tpu.iota {dimensions = array<i32: 1>} : vector<8x128xi32>
    %c4_i32 = arith.constant 4 : i32
    %67 = vector.broadcast %c4_i32 : i32 to vector<8x128xi32>
    %68 = arith.cmpi slt, %66, %67 : vector<8x128xi32>
    %cst_40 = arith.constant dense<0xFF800000> : vector<8xf32>
    %69 = vector.multi_reduction <maximumf>, %65, %cst_40 [1] : vector<8x128xf32> to vector<8xf32>
    %70 = vector.shape_cast %69 : vector<8xf32> to vector<8x1xf32>
    %71 = vector.broadcast %70 : vector<8x1xf32> to vector<8x128xf32>
    %72 = arith.subf %65, %71 : vector<8x128xf32>
    %73 = math.exp %72 : vector<8x128xf32>
    %cst_41 = arith.constant 0.000000e+00 : f32
    %74 = vector.broadcast %cst_41 : f32 to vector<8x128xf32>
    %75 = arith.select %68, %73, %74 : vector<8x128xi1>, vector<8x128xf32>
    %cst_42 = arith.constant dense<0.000000e+00> : vector<8xf32>
    %76 = vector.multi_reduction <add>, %75, %cst_42 [1] : vector<8x128xf32> to vector<8xf32>
    %77 = vector.shape_cast %76 : vector<8xf32> to vector<8x1xf32>
    %78 = tpu.reciprocal %77 {approx = true} : vector<8x1xf32> -> vector<8x1xf32>
    %79 = vector.broadcast %78 : vector<8x1xf32> to vector<8x128xf32>
    %80 = arith.mulf %75, %79 : vector<8x128xf32>
    %cst_43 = arith.constant 0.000000e+00 : f32
    %81 = vector.broadcast %cst_43 : f32 to vector<8x128xf32>
    %82 = arith.maximumf %65, %81 : vector<8x128xf32>
    %c0_44 = arith.constant 0 : index
    %c0_45 = arith.constant 0 : index
    %83 = vector.load %arg5[%c0_44, %c0_45] : memref<1x128xf32, #tpu.memory_space<vmem>>, vector<1x128xf32>
    %84 = vector.broadcast %83 : vector<1x128xf32> to vector<8x128xf32>
    %85 = arith.mulf %82, %84 : vector<8x128xf32>
    %cst_46 = arith.constant dense<0.000000e+00> : vector<8xf32>
    %86 = vector.multi_reduction <add>, %85, %cst_46 [1] : vector<8x128xf32> to vector<8xf32>
    %87 = vector.shape_cast %86 : vector<8xf32> to vector<8x1xf32>
    %c0_47 = arith.constant 0 : index
    %c0_48 = arith.constant 0 : index
    %88 = vector.load %arg6[%c0_47, %c0_48] : memref<1x1xf32, #tpu.memory_space<vmem>>, vector<1x1xf32>
    %89 = vector.broadcast %88 : vector<1x1xf32> to vector<8x1xf32>
    %90 = arith.addf %87, %89 : vector<8x1xf32>
    %cst_49 = arith.constant 0.000000e+00 : f32
    %91 = vector.broadcast %cst_49 : f32 to vector<8x1xf32>
    %92 = arith.subf %91, %90 : vector<8x1xf32>
    %93 = math.exp %92 : vector<8x1xf32>
    %cst_50 = arith.constant 1.000000e+00 : f32
    %94 = vector.broadcast %cst_50 : f32 to vector<8x1xf32>
    %95 = arith.addf %94, %93 : vector<8x1xf32>
    %96 = tpu.reciprocal %95 {approx = true} : vector<8x1xf32> -> vector<8x1xf32>
    %c4_i32_51 = arith.constant 4 : i32
    %97 = vector.broadcast %c4_i32_51 : i32 to vector<8x128xi32>
    %98 = arith.cmpi eq, %66, %97 : vector<8x128xi32>
    %cst_52 = arith.constant 0.000000e+00 : f32
    %99 = vector.shape_cast %96 : vector<8x1xf32> to vector<8x1xf32>
    %100 = vector.broadcast %99 : vector<8x1xf32> to vector<8x128xf32>
    %101 = vector.broadcast %cst_52 : f32 to vector<8x128xf32>
    %102 = arith.select %98, %100, %101 : vector<8x128xi1>, vector<8x128xf32>
    %103 = arith.select %68, %80, %102 : vector<8x128xi1>, vector<8x128xf32>
    %c0_53 = arith.constant 0 : index
    %c0_54 = arith.constant 0 : index
    %104 = vector.load %arg7[%c0_53, %c0_54] : memref<8x128xf32, #tpu.memory_space<vmem>>, vector<8x128xf32>
    tpu.vector_store %arg7[%c0_53, %c0_54], %103 {strides = array<i32>} : memref<8x128xf32, #tpu.memory_space<vmem>>, vector<8x128xf32>,
    return
  }
}

</mosaic_0001>

<bundles_post_ra>
// kernel: double_loss_forward.1
= control target key start
LH: loop header
LB: loop body
LE: loop exit
PB: predicated region body
PF: predicated region fallthrough
CT: control target
= control target key end

     0   :  { %v49_v0 = vlaneseq  ;;  %v5762_v2 = vmov 1983009808   ;;  %v5763_v11 = vmov 0   ;;  %s5764_s28 = smov 127   ;;  %s5765_s8 = smov 125   ;;  %vm175_vm0 = vcmask 1040384   ;;  %s7729_s0 = inlined_call_operand.vmem [shape: bf16[3,2176], index: 0, kind: input, shape index: {}]   ;;  %s7730_s1 = inlined_call_operand.vmem [shape: bf16[8,27], index: 1, kind: input, shape index: {}]   ;;  %s7731_s2 = inlined_call_operand.vmem [shape: f32[8,1], index: 2, kind: input, shape index: {}]   ;;  %s7732_s3 = inlined_call_operand.vmem [shape: f32[8,128], index: 3, kind: input, shape index: {}]   ;;  %s7733_s4 = inlined_call_operand.vmem [shape: f32[1,128], index: 4, kind: input, shape index: {}]   ;;  %s7734_s5 = inlined_call_operand.vmem [shape: f32[1,128], index: 5, kind: input, shape index: {}]   ;;  %s7735_s6 = inlined_call_operand.<no memory space> [shape: f32[1,1], index: 6, kind: input, shape index: {}]   ;;  %s7736_s7 = inlined_call_operand.vmem [shape: f32[8,128], index: 7, kind: output, shape index: {}]  }
   0x1   :  { %v29_v1 = vld [vmem:[%s7729_s0] sm:$0xff]  ;;  %v47_v3 = vunpack.c.l.s4 %v5762_v2  ;;  %259 = vmatprep.mubr.bf16.mxu0 %v5763_v11  ;;  %300 = vmatprep.mubr.bf16.mxu1 %v5763_v11  ;;  %v30_v14 = vld [vmem:[%s7729_s0 + $0x8] sm:$0xff]  ;;  %v31_v20 = vld [vmem:[%s7729_s0 + $0x10] sm:$0xff]  ;;  %s5766_s15 = smov 126   ;;  %s5767_s18 = smov 122   ;;  %vm176_vm1 = vcmask 1041408  }
   0x2   :  { %v5828_v4 = vshrl.u32 %v49_v0, 7  ;;  %v45_v6 = vcombine.high %v29_v1, %v29_v1  ;;  %v5836_v8 = vld [vmem:[%s7730_s1] sm:$0xf]  ;;  %5737 = vset.pattern.permute.xlu0 %v5763_v11  ;;  %v62_v17 = vcombine.high %v30_v14, %v30_v14  ;;  %v79_v23 = vcombine.high %v31_v20, %v31_v20  ;;  %v32_v26 = vld [vmem:[%s7729_s0 + $0x18] sm:$0xff]  ;;  %s5768_s19 = smov 96   ;;  %s5769_s22 = smov 119  }
   0x3   :  { %v48_v5 = vunpack.c.0.s8 %v47_v3  ;;  %v5600_v12 = vcombine.low %v5836_v8, %v5836_v8  ;;  %v96_v29 = vcombine.high %v32_v26, %v32_v26  ;;  %v5941_v33 = vld.sshfl [vmem:[%s7729_s0 + $0x20] sm:$0x3 pattern:$0x76325410]  ;;  %s5770_s23 = smov 95   ;;  %v5771_v39 = vmov 65535  }
   0x4   :  { %v5743_v34 = vld [vmem:[%s7730_s1] ss:$0 sps:$4 sm:$0xff]   ;;  %v177_v40 = vsel %vm175_vm0, 4294967295, %v5771_v39  ;;  %s5772_s26 = smov 116   ;;  %vm154_vm2 = vcmask 1039360   ;;  %vm171_vm3 = vcmask 23552  }
   0x5   :  { %v5831_v7 = vsub.s32 %v48_v5, %v5828_v4  ;;  %v5744_v35 = vld [vmem:[%s7730_s1] ss:$0 sps:$4 sm:$0xff]   ;;  %v6000_v41 = vsel %vm176_vm1, %v177_v40, 0  ;;  %s5773_s27 = smov 94   ;;  %s5774_s30 = smov 113   ;;  %vm1059_vm4 = vcmask 1031168  }
   0x6   :  { %v5745_v36 = vld [vmem:[%s7730_s1] ss:$0 sps:$4 sm:$0xff]   ;;  %s5776_s11 = smov 110   ;;  %vm1596_vm5 = vcmask 785408   ;;  %s5777_s14 = smov 63   ;;  %vm2133_vm6 = vcmask 777216  }
   0x7   :  { %v5839_v9 = vrot.slane %v29_v1, %v5831_v7  ;;  %v5842_v10 = vrot.slane %v45_v6, %v5831_v7  ;;  %v5863_v15 = vrot.slane %v30_v14, %v5831_v7  ;;  %v5878_v19 = vrot.slane %v62_v17, %v5831_v7 }
   0x8   :  { %v5892_v22 = vrot.slane %v31_v20, %v5831_v7  ;;  %v5903_v25 = vrot.slane %v79_v23, %v5831_v7  ;;  %v5917_v28 = vrot.slane %v32_v26, %v5831_v7  ;;  %v5928_v31 = vrot.slane %v96_v29, %v5831_v7 }
   0x9   :  { %120 = vrot.lane.b32.xlu1 %v5839_v9, %s5764_s28  ;;  %124 = vrot.lane.b32.xlu0 %v5842_v10, %s5764_s28  ;;  %v5854_v13 = vcombine.high %v5839_v9, %v5839_v9  ;;  %v5867_v16 = vcombine.high %v5842_v10, %v5842_v10  ;;  %v5875_v18 = vcombine.high %v5863_v15, %v5863_v15  ;;  %vm2670_vm7 = vcmask 769024  }
   0xa   :  { %v5889_v21 = vcombine.high %v5878_v19, %v5878_v19  ;;  %v5900_v24 = vcombine.high %v5892_v22, %v5892_v22  ;;  %v5914_v27 = vcombine.high %v5903_v25, %v5903_v25  ;;  %v5925_v30 = vcombine.high %v5917_v28, %v5917_v28 }
   0xb   :  { %v5936_v32 = vcombine.high %v5928_v31, %v5928_v31  ;;  %vm3207_vm8 = vcmask 523264   ;;  %vm3744_vm9 = vcmask 515072   ;;  %vm4281_vm10 = vcmask 506880  }
   0xd   :  { %38 = vrot.lane.b32.xlu1 %v5600_v12, %s5765_s8  ;;  %122 = vrot.lane.b32.xlu0 %v5854_v13, %s5764_s28  ;;  %s5775_s8 = smov 64  }
  0x11   :  { %128 = vrot.lane.b32.xlu0 %v5863_v15, %s5764_s28  ;;  %126 = vrot.lane.b32.xlu1 %v5867_v16, %s5764_s28 }
  0x15   :  { %130 = vrot.lane.b32.xlu0 %v5875_v18, %s5764_s28  ;;  %132 = vrot.lane.b32.xlu1 %v5878_v19, %s5764_s28 }
  0x19   :  { %134 = vrot.lane.b32.xlu0 %v5889_v21, %s5764_s28  ;;  %136 = vrot.lane.b32.xlu1 %v5892_v22, %s5764_s28 }
  0x1d   :  { %138 = vrot.lane.b32.xlu0 %v5900_v24, %s5764_s28  ;;  %140 = vrot.lane.b32.xlu1 %v5903_v25, %s5764_s28 }
  0x21   :  { %142 = vrot.lane.b32.xlu0 %v5914_v27, %s5764_s28  ;;  %144 = vrot.lane.b32.xlu1 %v5917_v28, %s5764_s28 }
  0x25   :  { %146 = vrot.lane.b32.xlu0 %v5925_v30, %s5764_s28  ;;  %148 = vrot.lane.b32.xlu1 %v5928_v31, %s5764_s28 }
  0x29   :  { %150 = vrot.lane.b32.xlu0 %v5936_v32, %s5764_s28  ;;  %152 = vrot.lane.b32.xlu1 %v5941_v33, %s5764_s28 }
  0x2d   :  { %1027 = vrot.lane.b32.xlu0 %v5854_v13, %s5766_s15  ;;  %1029 = vrot.lane.b32.xlu1 %v5842_v10, %s5766_s15 }
  0x31   :  { %1025 = vrot.lane.b32.xlu0 %v5839_v9, %s5766_s15  ;;  %1031 = vrot.lane.b32.xlu1 %v5867_v16, %s5766_s15 }
  0x35   :  { %1033 = vrot.lane.b32.xlu0 %v5863_v15, %s5766_s15  ;;  %943 = vrot.lane.b32.xlu1 %v5743_v34, %s5767_s18 }
  0x39   :  { %1035 = vrot.lane.b32.xlu0 %v5875_v18, %s5766_s15  ;;  %1037 = vrot.lane.b32.xlu1 %v5878_v19, %s5766_s15 }
  0x3d   :  { %1039 = vrot.lane.b32.xlu0 %v5889_v21, %s5766_s15  ;;  %1041 = vrot.lane.b32.xlu1 %v5892_v22, %s5766_s15 }
  0x41   :  { %1043 = vrot.lane.b32.xlu0 %v5900_v24, %s5766_s15  ;;  %1045 = vrot.lane.b32.xlu1 %v5903_v25, %s5766_s15 }
  0x45   :  { %1047 = vrot.lane.b32.xlu0 %v5914_v27, %s5766_s15  ;;  %1049 = vrot.lane.b32.xlu1 %v5917_v28, %s5766_s15 }
  0x49   :  { %1051 = vrot.lane.b32.xlu0 %v5925_v30, %s5766_s15  ;;  %1053 = vrot.lane.b32.xlu1 %v5928_v31, %s5766_s15 }
  0x4d   :  { %1055 = vrot.lane.b32.xlu0 %v5936_v32, %s5766_s15  ;;  %1057 = vrot.lane.b32.xlu1 %v5941_v33, %s5766_s15 }
  0x51   :  { %1564 = vrot.lane.b32.xlu0 %v5854_v13, %s5768_s19  ;;  %1566 = vrot.lane.b32.xlu1 %v5842_v10, %s5768_s19 }
  0x55   :  { %1562 = vrot.lane.b32.xlu0 %v5839_v9, %s5768_s19  ;;  %1568 = vrot.lane.b32.xlu1 %v5867_v16, %s5768_s19 }
  0x59   :  { %1570 = vrot.lane.b32.xlu0 %v5863_v15, %s5768_s19  ;;  %1480 = vrot.lane.b32.xlu1 %v5744_v35, %s5769_s22 }
  0x5d   :  { %1572 = vrot.lane.b32.xlu0 %v5875_v18, %s5768_s19  ;;  %1574 = vrot.lane.b32.xlu1 %v5878_v19, %s5768_s19 }
  0x61   :  { %1576 = vrot.lane.b32.xlu0 %v5889_v21, %s5768_s19  ;;  %1578 = vrot.lane.b32.xlu1 %v5892_v22, %s5768_s19 }
  0x65   :  { %1580 = vrot.lane.b32.xlu0 %v5900_v24, %s5768_s19  ;;  %1582 = vrot.lane.b32.xlu1 %v5903_v25, %s5768_s19 }
  0x69   :  { %1584 = vrot.lane.b32.xlu0 %v5914_v27, %s5768_s19  ;;  %1586 = vrot.lane.b32.xlu1 %v5917_v28, %s5768_s19 }
  0x6d   :  { %1588 = vrot.lane.b32.xlu0 %v5925_v30, %s5768_s19  ;;  %1590 = vrot.lane.b32.xlu1 %v5928_v31, %s5768_s19 }
  0x71   :  { %1592 = vrot.lane.b32.xlu0 %v5936_v32, %s5768_s19  ;;  %1594 = vrot.lane.b32.xlu1 %v5941_v33, %s5768_s19  ;;  %s5778_s19 = smov 107  }
  0x75   :  { %2101 = vrot.lane.b32.xlu0 %v5854_v13, %s5770_s23  ;;  %2103 = vrot.lane.b32.xlu1 %v5842_v10, %s5770_s23 }
  0x79   :  { %2099 = vrot.lane.b32.xlu0 %v5839_v9, %s5770_s23  ;;  %2105 = vrot.lane.b32.xlu1 %v5867_v16, %s5770_s23 }
  0x7b   :  { %v121_v37 = vpop.permute.xlu1 %120  ;;  %v125_v38 = vpop.permute.xlu0 %124 }
  0x7d   :  { %2107 = vrot.lane.b32.xlu0 %v5863_v15, %s5770_s23  ;;  %2017 = vrot.lane.b32.xlu1 %v5745_v36, %s5772_s26 }
  0x7f   :  { %v6002_v42 = vpop.permute.xlu1 %38  ;;  %v123_v43 = vpop.permute.xlu0 %122 }
  0x80   :  { %v156_v44 = vsel %vm154_vm2, %v123_v43, %v125_v38  ;;  %v155_v45 = vsel %vm154_vm2, %v121_v37, %v123_v43 }
  0x81   :  { %2109 = vrot.lane.b32.xlu0 %v5875_v18, %s5770_s23  ;;  %2111 = vrot.lane.b32.xlu1 %v5878_v19, %s5770_s23  ;;  %v183_v46 = vand.u32 %v6000_v41, %v156_v44  ;;  %v180_v47 = vand.u32 %v6000_v41, %v155_v45  ;;  %v562_v44 = vand.u32 %v6000_v41, %v5854_v13 }
  0x83   :  { %241 = vmatprep.subr.bf16.mxu0 %v183_v46  ;;  %v129_v48 = vpop.permute.xlu0 %128  ;;  %v127_v49 = vpop.permute.xlu1 %126 }
  0x84   :  { %242 = vmatpush1.bf16.msra.mxu0 %v180_v47  ;;  %v158_v50 = vsel %vm154_vm2, %v127_v49, %v129_v48  ;;  %v157_v51 = vsel %vm154_vm2, %v125_v38, %v127_v49  ;;  %v559_v49 = vand.u32 %v6000_v41, %v5839_v9 }
  0x85   :  { %2113 = vrot.lane.b32.xlu0 %v5889_v21, %s5770_s23  ;;  %2115 = vrot.lane.b32.xlu1 %v5892_v22, %s5770_s23  ;;  %v189_v52 = vand.u32 %v6000_v41, %v158_v50  ;;  %v186_v53 = vand.u32 %v6000_v41, %v157_v51 }
  0x87   :  { %5602 = vmatmul.mubr.msk.bf16.vlgmr.msra.gmra.mxu0 %vm171_vm3, %v6002_v42  ;;  %v131_v54 = vpop.permute.xlu0 %130  ;;  %282 = vmatprep.subr.bf16.mxu1 %v189_v52  ;;  %v133_v55 = vpop.permute.xlu1 %132  ;;  %v5746_v52 = vld [vmem:[%s7730_s1] ss:$0 sps:$4 sm:$0xff]  }
  0x88   :  { %v159_v56 = vsel %vm154_vm2, %v129_v48, %v131_v54  ;;  %v160_v57 = vsel %vm154_vm2, %v131_v54, %v133_v55  ;;  %283 = vmatpush1.bf16.msra.mxu1 %v186_v53  ;;  %341 = vmatprep.mubr.bf16.mxu0 %v5763_v11  ;;  %v568_v53 = vand.u32 %v6000_v41, %v5867_v16 }
  0x89   :  { %v192_v58 = vand.u32 %v6000_v41, %v159_v56  ;;  %2117 = vrot.lane.b32.xlu0 %v5900_v24, %s5770_s23  ;;  %2119 = vrot.lane.b32.xlu1 %v5903_v25, %s5770_s23  ;;  %v195_v59 = vand.u32 %v6000_v41, %v160_v57  ;;  %v574_v56 = vand.u32 %v6000_v41, %v5875_v18 }
  0x8a   :  { %v565_v57 = vand.u32 %v6000_v41, %v5842_v10 }
  0x8b   :  { %v135_v60 = vpop.permute.xlu0 %134  ;;  %5603 = vmatmul.mubr.msk.bf16.vlgmr.msra.gmra.mxu1 %vm171_vm3, %v6002_v42  ;;  %323 = vmatprep.subr.bf16.mxu0 %v195_v59  ;;  %v137_v61 = vpop.permute.xlu1 %136 }
  0x8c   :  { %v161_v62 = vsel %vm154_vm2, %v133_v55, %v135_v60  ;;  %v162_v63 = vsel %vm154_vm2, %v135_v60, %v137_v61  ;;  %324 = vmatpush1.bf16.msra.mxu0 %v192_v58  ;;  %382 = vmatprep.mubr.bf16.mxu1 %v5763_v11  ;;  %v580_v58 = vand.u32 %v6000_v41, %v5889_v21 }
  0x8d   :  { %v198_v1 = vand.u32 %v6000_v41, %v161_v62  ;;  %2121 = vrot.lane.b32.xlu0 %v5914_v27, %s5770_s23  ;;  %2123 = vrot.lane.b32.xlu1 %v5917_v28, %s5770_s23  ;;  %v201_v2 = vand.u32 %v6000_v41, %v162_v63  ;;  %v586_v62 = vand.u32 %v6000_v41, %v5900_v24 }
  0x8f   :  { %v139_v3 = vpop.permute.xlu0 %138  ;;  %5604 = vmatmul.mubr.msk.bf16.vlgmr.msra.gmra.mxu0 %vm171_vm3, %v6002_v42  ;;  %364 = vmatprep.subr.bf16.mxu1 %v201_v2  ;;  %v141_v5 = vpop.permute.xlu1 %140  ;;  %v592_v2 = vand.u32 %v6000_v41, %v5914_v27 }
  0x90   :  { %v163_v6 = vsel %vm154_vm2, %v137_v61, %v139_v3  ;;  %v164_v12 = vsel %vm154_vm2, %v139_v3, %v141_v5  ;;  %365 = vmatpush1.bf16.msra.mxu1 %v198_v1  ;;  %423 = vmatprep.mubr.bf16.mxu0 %v5763_v11  ;;  %v571_v61 = vand.u32 %v6000_v41, %v5863_v15 }
  0x91   :  { %v204_v14 = vand.u32 %v6000_v41, %v163_v6  ;;  %2125 = vrot.lane.b32.xlu0 %v5925_v30, %s5770_s23  ;;  %2127 = vrot.lane.b32.xlu1 %v5928_v31, %s5770_s23  ;;  %v207_v17 = vand.u32 %v6000_v41, %v164_v12  ;;  %v577_v1 = vand.u32 %v6000_v41, %v5878_v19 }
  0x92   :  { %v583_v6 = vand.u32 %v6000_v41, %v5892_v22  ;;  %v598_v12 = vand.u32 %v6000_v41, %v5925_v30 }
  0x93   :  { %v143_v20 = vpop.permute.xlu0 %142  ;;  %5605 = vmatmul.mubr.msk.bf16.vlgmr.msra.gmra.mxu1 %vm171_vm3, %v6002_v42  ;;  %405 = vmatprep.subr.bf16.mxu0 %v207_v17  ;;  %v145_v23 = vpop.permute.xlu1 %144 }
  0x94   :  { %v165_v26 = vsel %vm154_vm2, %v141_v5, %v143_v20  ;;  %v166_v29 = vsel %vm154_vm2, %v143_v20, %v145_v23  ;;  %406 = vmatpush1.bf16.msra.mxu0 %v204_v14  ;;  %464 = vmatprep.mubr.bf16.mxu1 %v5763_v11  ;;  %v589_v20 = vand.u32 %v6000_v41, %v5903_v25 }
  0x95   :  { %v210_v34 = vand.u32 %v6000_v41, %v165_v26  ;;  %2129 = vrot.lane.b32.xlu0 %v5936_v32, %s5770_s23  ;;  %2131 = vrot.lane.b32.xlu1 %v5941_v33, %s5770_s23  ;;  %v213_v35 = vand.u32 %v6000_v41, %v166_v29 }
  0x97   :  { %v147_v36 = vpop.permute.xlu0 %146  ;;  %5606 = vmatmul.mubr.msk.bf16.vlgmr.msra.gmra.mxu0 %vm171_vm3, %v6002_v42  ;;  %446 = vmatprep.subr.bf16.mxu1 %v213_v35  ;;  %v149_v37 = vpop.permute.xlu1 %148  ;;  %v595_v35 = vand.u32 %v6000_v41, %v5917_v28 }
  0x98   :  { %v167_v38 = vsel %vm154_vm2, %v145_v23, %v147_v36  ;;  %v168_v39 = vsel %vm154_vm2, %v147_v36, %v149_v37  ;;  %447 = vmatpush1.bf16.msra.mxu1 %v210_v34  ;;  %505 = vmatprep.mubr.bf16.mxu0 %v5763_v11  ;;  %v604_v23 = vand.u32 %v6000_v41, %v5936_v32 }
  0x99   :  { %v216_v40 = vand.u32 %v6000_v41, %v167_v38  ;;  %2638 = vrot.lane.b32.xlu0 %v5854_v13, %s5773_s27  ;;  %2640 = vrot.lane.b32.xlu1 %v5842_v10, %s5773_s27  ;;  %v219_v43 = vand.u32 %v6000_v41, %v168_v39 }
  0x9b   :  { %v151_v45 = vpop.permute.xlu0 %150  ;;  %5607 = vmatmul.mubr.msk.bf16.vlgmr.msra.gmra.mxu1 %vm171_vm3, %v6002_v42  ;;  %487 = vmatprep.subr.bf16.mxu0 %v219_v43  ;;  %v153_v46 = vpop.permute.xlu1 %152 }
  0x9c   :  { %v169_v47 = vsel %vm154_vm2, %v149_v37, %v151_v45  ;;  %v170_v48 = vsel %vm154_vm2, %v151_v45, %v153_v46  ;;  %488 = vmatpush1.bf16.msra.mxu0 %v216_v40  ;;  %546 = vmatprep.mubr.bf16.mxu1 %v5763_v11  ;;  %v601_v40 = vand.u32 %v6000_v41, %v5928_v31 }
  0x9d   :  { %v222_v50 = vand.u32 %v6000_v41, %v169_v47  ;;  %v225_v51 = vand.u32 %v6000_v41, %v170_v48  ;;  %2636 = vrot.lane.b32.xlu0 %v5839_v9, %s5773_s27  ;;  %2642 = vrot.lane.b32.xlu1 %v5867_v16, %s5773_s27 }
  0x9e   :  { %620 = vmatprep.subr.bf16.mxu0 %v562_v44 }
  0x9f   :  { %v6095_v54 = vpop.permute.xlu0 %1027  ;;  %5608 = vmatmul.mubr.msk.bf16.vlgmr.msra.gmra.mxu0 %vm171_vm3, %v6002_v42  ;;  %528 = vmatprep.subr.bf16.mxu1 %v225_v51  ;;  %v6099_v55 = vpop.permute.xlu1 %1029 }
  0xa0   :  { %529 = vmatpush1.bf16.msra.mxu1 %v222_v50  ;;  %621 = vmatpush1.bf16.msra.mxu0 %v559_v49  ;;  %v1061_v34 = vsel %vm1059_vm4, %v6095_v54, %v6099_v55 }
  0xa1   :  { %2644 = vrot.lane.b32.xlu0 %v5863_v15, %s5773_s27  ;;  %2554 = vrot.lane.b32.xlu1 %v5746_v52, %s5774_s30  ;;  %v1083_v38 = vand.u32 %v1061_v34, %v6000_v41 }
  0xa2   :  { %638 = vmatprep.mubr.bf16.mxu0 %v5763_v11  ;;  %661 = vmatprep.subr.bf16.mxu1 %v568_v53  ;;  %v5747_v53 = vld [vmem:[%s7730_s1] ss:$0 sps:$4 sm:$0xff]  }
  0xa3   :  { %v6110_v59 = vpop.permute.xlu0 %1025  ;;  %5609 = vmatmul.mubr.msk.bf16.vlgmr.msra.gmra.mxu1 %vm171_vm3, %v6002_v42  ;;  %v6114_v60 = vpop.permute.xlu1 %1031  ;;  %702 = vmatprep.subr.bf16.mxu0 %v574_v56 }
  0xa4   :  { %662 = vmatpush1.bf16.msra.mxu1 %v565_v57  ;;  %679 = vmatprep.mubr.bf16.mxu1 %v5763_v11  ;;  %v1060_v43 = vsel %vm1059_vm4, %v6110_v59, %v6095_v54  ;;  %v1062_v49 = vsel %vm1059_vm4, %v6099_v55, %v6114_v60 }
  0xa5   :  { %2646 = vrot.lane.b32.xlu0 %v5875_v18, %s5773_s27  ;;  %2648 = vrot.lane.b32.xlu1 %v5878_v19, %s5773_s27  ;;  %v1080_v48 = vand.u32 %v1060_v43, %v6000_v41 }
  0xa6   :  { %743 = vmatprep.subr.bf16.mxu1 %v580_v58 }
  0xa7   :  { %v6125_v42 = vpop.permute.xlu0 %1033  ;;  %5610 = vmatmul.mubr.msk.bf16.vlgmr.msra.gmra.mxu0 %vm171_vm3, %v5836_v8  ;;  %v6129_v63 = vpop.permute.xlu1 %943 }
  0xa8   :  { %703 = vmatpush1.bf16.msra.mxu0 %v571_v61  ;;  %720 = vmatprep.mubr.bf16.mxu0 %v5763_v11  ;;  %v1063_v39 = vsel %vm1059_vm4, %v6114_v60, %v6125_v42 }
  0xa9   :  { %2650 = vrot.lane.b32.xlu0 %v5889_v21, %s5773_s27  ;;  %2652 = vrot.lane.b32.xlu1 %v5892_v22, %s5773_s27  ;;  %v1089_v46 = vand.u32 %v1063_v39, %v6000_v41 }
  0xaa   :  { %784 = vmatprep.subr.bf16.mxu0 %v586_v62 }
  0xab   :  { %v6140_v3 = vpop.permute.xlu0 %1035  ;;  %v6142_v5 = vpop.permute.xlu1 %1037  ;;  %5611 = vmatmul.mubr.msk.bf16.vlgmr.msra.gmra.mxu1 %vm171_vm3, %v5836_v8 }
  0xac   :  { %744 = vmatpush1.bf16.msra.mxu1 %v577_v1  ;;  %761 = vmatprep.mubr.bf16.mxu1 %v5763_v11  ;;  %v1065_v47 = vsel %vm1059_vm4, %v6140_v3, %v6142_v5  ;;  %v1064_v54 = vsel %vm1059_vm4, %v6125_v42, %v6140_v3 }
  0xad   :  { %2654 = vrot.lane.b32.xlu0 %v5900_v24, %s5773_s27  ;;  %2656 = vrot.lane.b32.xlu1 %v5903_v25, %s5773_s27  ;;  %v1095_v52 = vand.u32 %v1065_v47, %v6000_v41  ;;  %v1092_v57 = vand.u32 %v1064_v54, %v6000_v41 }
  0xae   :  { %825 = vmatprep.subr.bf16.mxu1 %v592_v2 }
  0xaf   :  { %v6155_v14 = vpop.permute.xlu0 %1039  ;;  %5612 = vmatmul.mubr.msk.bf16.vlgmr.msra.gmra.mxu0 %vm171_vm3, %v5836_v8  ;;  %v6159_v17 = vpop.permute.xlu1 %1041 }
  0xb0   :  { %785 = vmatpush1.bf16.msra.mxu0 %v583_v6  ;;  %802 = vmatprep.mubr.bf16.mxu0 %v5763_v11 }
  0xb1   :  { %2658 = vrot.lane.b32.xlu0 %v5914_v27, %s5773_s27  ;;  %2660 = vrot.lane.b32.xlu1 %v5917_v28, %s5773_s27 }
  0xb2   :  { %866 = vmatprep.subr.bf16.mxu0 %v598_v12 }
  0xb3   :  { %v6170_v26 = vpop.permute.xlu0 %1043  ;;  %v6172_v29 = vpop.permute.xlu1 %1045  ;;  %5613 = vmatmul.mubr.msk.bf16.vlgmr.msra.gmra.mxu1 %vm171_vm3, %v5836_v8 }
  0xb4   :  { %826 = vmatpush1.bf16.msra.mxu1 %v589_v20  ;;  %843 = vmatprep.mubr.bf16.mxu1 %v5763_v11  ;;  %v1068_v62 = vsel %vm1059_vm4, %v6159_v17, %v6170_v26 }
  0xb5   :  { %2662 = vrot.lane.b32.xlu0 %v5925_v30, %s5773_s27  ;;  %2664 = vrot.lane.b32.xlu1 %v5928_v31, %s5773_s27 }
  0xb6   :  { %907 = vmatprep.subr.bf16.mxu1 %v604_v23 }
  0xb7   :  { %v6186_v36 = vpop.permute.xlu0 %1047  ;;  %5614 = vmatmul.mubr.msk.bf16.vlgmr.msra.gmra.mxu0 %vm171_vm3, %v5836_v8  ;;  %v6190_v37 = vpop.permute.xlu1 %1049 }
  0xb8   :  { %867 = vmatpush1.bf16.msra.mxu0 %v595_v35  ;;  %884 = vmatprep.mubr.bf16.mxu0 %v5763_v11  ;;  %v1070_v3 = vsel %vm1059_vm4, %v6172_v29, %v6186_v36 }
  0xb9   :  { %1141 = vmatprep.subr.bf16.mxu0 %v1083_v38  ;;  %2666 = vrot.lane.b32.xlu0 %v5936_v32, %s5773_s27 }
  0xba   :  { %2668 = vrot.lane.b32.xlu1 %v5941_v33, %s5773_s27 }
  0xbb   :  { %v6206_v44 = vpop.permute.xlu0 %1051  ;;  %v6208_v45 = vpop.permute.xlu1 %1053  ;;  %5615 = vmatmul.mubr.msk.bf16.vlgmr.msra.gmra.mxu1 %vm171_vm3, %v5836_v8 }
  0xbc   :  { %908 = vmatpush1.bf16.msra.mxu1 %v601_v40  ;;  %925 = vmatprep.mubr.bf16.mxu1 %v5763_v11 }
  0xbd   :  { %1182 = vmatprep.subr.bf16.mxu1 %v1089_v46  ;;  %3175 = vrot.lane.b32.xlu0 %v5854_v13, %s5775_s8  ;;  %v1067_v13 = vsel %vm1059_vm4, %v6155_v14, %v6159_v17 }
  0xbe   :  { %3177 = vrot.lane.b32.xlu1 %v5842_v10, %s5775_s8  ;;  %v1086_v10 = vand.u32 %v1062_v49, %v6000_v41 }
  0xbf   :  { %v6225_v50 = vpop.permute.xlu0 %1055  ;;  %5616 = vmatmul.mubr.msk.bf16.vlgmr.msra.gmra.mxu0 %vm171_vm3, %v5836_v8  ;;  %v1058_v51 = vpop.permute.xlu1 %1057 }
  0xc0   :  { %1142 = vmatpush1.bf16.msra.mxu0 %v1080_v48  ;;  %1159 = vmatprep.mubr.bf16.mxu0 %v5763_v11 }
  0xc1   :  { %1223 = vmatprep.subr.bf16.mxu0 %v1095_v52  ;;  %3173 = vrot.lane.b32.xlu0 %v5839_v9, %s5775_s8  ;;  %v1101_v9 = vand.u32 %v1067_v13, %v6000_v41  ;;  %v3620_v52 = vld [vmem:[%s7729_s0 + $0x8] sm:$0xff] }
  0xc2   :  { %3179 = vrot.lane.b32.xlu1 %v5867_v16, %s5775_s8  ;;  %v1069_v16 = vsel %vm1059_vm4, %v6170_v26, %v6172_v29  ;;  %v3619_v26 = vld [vmem:[%s7729_s0] sm:$0xff]  ;;  %v1074_v29 = vsel %vm1059_vm4, %v6208_v45, %v6225_v50 }
  0xc3   :  { %v6245_v55 = vpop.permute.xlu0 %1564  ;;  %v6247_v56 = vpop.permute.xlu1 %1566  ;;  %5617 = vmatmul.mubr.msk.bf16.vlgmr.msra.gmra.mxu1 %vm171_vm3, %v5836_v8  ;;  %v1066_v8 = vsel %vm1059_vm4, %v6142_v5, %v6155_v14  ;;  %v1107_v60 = vand.u32 %v1069_v16, %v6000_v41  ;;  %v1072_v14 = vsel %vm1059_vm4, %v6190_v37, %v6206_v44  ;;  %v3635_v38 = vcombine.high %v3619_v26, %v3619_v26 }
  0xc4   :  { %1183 = vmatpush1.bf16.msra.mxu1 %v1086_v10  ;;  %1200 = vmatprep.mubr.bf16.mxu1 %v5763_v11  ;;  %v1098_v61 = vand.u32 %v1066_v8, %v6000_v41  ;;  %v3652_v16 = vcombine.high %v3620_v52, %v3620_v52 }
  0xc5   :  { %1264 = vmatprep.subr.bf16.mxu1 %v1101_v9  ;;  %3181 = vrot.lane.b32.xlu0 %v5863_v15, %s5775_s8  ;;  %v1071_v15 = vsel %vm1059_vm4, %v6186_v36, %v6190_v37  ;;  %v6354_v36 = vrot.slane %v3619_v26, %v5831_v7  ;;  %v1122_v37 = vand.u32 %v1074_v29, %v6000_v41 }
  0xc6   :  { %3091 = vrot.lane.b32.xlu1 %v5747_v53, %s5776_s11  ;;  %v1113_v2 = vand.u32 %v1071_v15, %v6000_v41  ;;  %v6383_v46 = vrot.slane %v3635_v38, %v5831_v7 }
  0xc7   :  { %v6262_v58 = vpop.permute.xlu0 %1562  ;;  %5620 = vmatmul.mubr.msk.bf16.vlgmr.msra.gmra.mxu0 %vm171_vm3, %v6129_v63  ;;  %v6266_v59 = vpop.permute.xlu1 %1568 }
  0xc8   :  { %1224 = vmatpush1.bf16.msra.mxu0 %v1092_v57  ;;  %1241 = vmatprep.mubr.bf16.mxu0 %v5763_v11  ;;  %v1597_v39 = vsel %vm1596_vm5, %v6262_v58, %v6245_v55  ;;  %v1599_v47 = vsel %vm1596_vm5, %v6247_v56, %v6266_v59 }
  0xc9   :  { %1305 = vmatprep.subr.bf16.mxu0 %v1107_v60  ;;  %3183 = vrot.lane.b32.xlu0 %v5875_v18, %s5775_s8  ;;  %v1073_v18 = vsel %vm1059_vm4, %v6206_v44, %v6208_v45  ;;  %v1617_v45 = vand.u32 %v1597_v39, %v6000_v41 }
  0xca   :  { %3185 = vrot.lane.b32.xlu1 %v5878_v19, %s5775_s8  ;;  %v1104_v19 = vand.u32 %v1068_v62, %v6000_v41  ;;  %v1119_v12 = vand.u32 %v1073_v18, %v6000_v41  ;;  %v6456_v62 = vrot.slane %v3652_v16, %v5831_v7 }
  0xcb   :  { %v6281_v42 = vpop.permute.xlu0 %1570  ;;  %v6283_v1 = vpop.permute.xlu1 %1480  ;;  %5621 = vmatmul.mubr.msk.bf16.vlgmr.msra.gmra.mxu1 %vm171_vm3, %v6129_v63 }
  0xcc   :  { %1265 = vmatpush1.bf16.msra.mxu1 %v1098_v61  ;;  %1282 = vmatprep.mubr.bf16.mxu1 %v5763_v11 }
  0xcd   :  { %1346 = vmatprep.subr.bf16.mxu1 %v1113_v2  ;;  %3187 = vrot.lane.b32.xlu0 %v5889_v21, %s5775_s8  ;;  %v1075_v21 = vsel %vm1059_vm4, %v6225_v50, %v1058_v51  ;;  %v1623_v50 = vand.u32 %v1599_v47, %v6000_v41  ;;  %v6406_v51 = vcombine.high %v6383_v46, %v6383_v46 }
  0xce   :  { %3189 = vrot.lane.b32.xlu1 %v5892_v22, %s5775_s8  ;;  %v1110_v22 = vand.u32 %v1070_v3, %v6000_v41  ;;  %v1125_v17 = vand.u32 %v1075_v21, %v6000_v41  ;;  %v3621_v3 = vld [vmem:[%s7729_s0 + $0x10] sm:$0xff] }
  0xcf   :  { %v6300_v5 = vpop.permute.xlu0 %1572  ;;  %5622 = vmatmul.mubr.msk.bf16.vlgmr.msra.gmra.mxu0 %vm171_vm3, %v6129_v63  ;;  %v6304_v6 = vpop.permute.xlu1 %1574  ;;  %v6483_v21 = vrot.slane %v3621_v3, %v5831_v7 }
  0xd0   :  { %1306 = vmatpush1.bf16.msra.mxu0 %v1104_v19  ;;  %1323 = vmatprep.mubr.bf16.mxu0 %v5763_v11  ;;  %v1602_v44 = vsel %vm1596_vm5, %v6300_v5, %v6304_v6  ;;  %v1601_v13 = vsel %vm1596_vm5, %v6281_v42, %v6300_v5 }
  0xd1   :  { %1387 = vmatprep.subr.bf16.mxu0 %v1119_v12  ;;  %3191 = vrot.lane.b32.xlu0 %v5900_v24, %s5775_s8  ;;  %v1598_v24 = vsel %vm1596_vm5, %v6245_v55, %v6247_v56  ;;  %v1632_v49 = vand.u32 %v1602_v44, %v6000_v41  ;;  %v6426_v56 = vrot.slane %v3620_v52, %v5831_v7 }
  0xd2   :  { %3193 = vrot.lane.b32.xlu1 %v5903_v25, %s5775_s8  ;;  %v1116_v25 = vand.u32 %v1072_v14, %v6000_v41  ;;  %v1629_v9 = vand.u32 %v1601_v13, %v6000_v41 }
  0xd3   :  { %v6319_v20 = vpop.permute.xlu0 %1576  ;;  %v6321_v23 = vpop.permute.xlu1 %1578  ;;  %5623 = vmatmul.mubr.msk.bf16.vlgmr.msra.gmra.mxu1 %vm171_vm3, %v6129_v63  ;;  %v6452_v15 = vcombine.high %v6426_v56, %v6426_v56 }
  0xd4   :  { %1347 = vmatpush1.bf16.msra.mxu1 %v1110_v22  ;;  %1364 = vmatprep.mubr.bf16.mxu1 %v5763_v11  ;;  %v1603_v57 = vsel %vm1596_vm5, %v6304_v6, %v6319_v20  ;;  %v6477_v6 = vcombine.high %v6456_v62, %v6456_v62  ;;  %v3669_v22 = vcombine.high %v3621_v3, %v3621_v3 }
  0xd5   :  { %1428 = vmatprep.subr.bf16.mxu1 %v1125_v17  ;;  %3195 = vrot.lane.b32.xlu0 %v5914_v27, %s5775_s8  ;;  %v1620_v27 = vand.u32 %v1598_v24, %v6000_v41  ;;  %v1635_v61 = vand.u32 %v1603_v57, %v6000_v41 }
  0xd6   :  { %3197 = vrot.lane.b32.xlu1 %v5917_v28, %s5775_s8  ;;  %v1600_v28 = vsel %vm1596_vm5, %v6266_v59, %v6281_v42  ;;  %v6508_v29 = vrot.slane %v3669_v22, %v5831_v7 }
  0xd7   :  { %v6340_v34 = vpop.permute.xlu0 %1580  ;;  %5624 = vmatmul.mubr.msk.bf16.vlgmr.msra.gmra.mxu0 %vm171_vm3, %v6129_v63  ;;  %v6344_v35 = vpop.permute.xlu1 %1582 }
  0xd8   :  { %1388 = vmatpush1.bf16.msra.mxu0 %v1116_v25  ;;  %1405 = vmatprep.mubr.bf16.mxu0 %v5763_v11  ;;  %v1606_v55 = vsel %vm1596_vm5, %v6340_v34, %v6344_v35  ;;  %v1605_v42 = vsel %vm1596_vm5, %v6321_v23, %v6340_v34  ;;  %v6502_v25 = vcombine.high %v6483_v21, %v6483_v21 }
  0xd9   :  { %1678 = vmatprep.subr.bf16.mxu0 %v1620_v27  ;;  %3199 = vrot.lane.b32.xlu0 %v5925_v30, %s5775_s8  ;;  %v1626_v30 = vand.u32 %v1600_v28, %v6000_v41  ;;  %v1644_v59 = vand.u32 %v1606_v55, %v6000_v41  ;;  %v1641_v12 = vand.u32 %v1605_v42, %v6000_v41 }
  0xda   :  { %3201 = vrot.lane.b32.xlu1 %v5928_v31, %s5775_s8  ;;  %v6377_v31 = vcombine.high %v6354_v36, %v6354_v36  ;;  %v6529_v39 = vcombine.high %v6508_v29, %v6508_v29 }
  0xdb   :  { %v6362_v40 = vpop.permute.xlu0 %1584  ;;  %v6364_v43 = vpop.permute.xlu1 %1586  ;;  %5625 = vmatmul.mubr.msk.bf16.vlgmr.msra.gmra.mxu1 %vm171_vm3, %v6129_v63 }
  0xdc   :  { %1429 = vmatpush1.bf16.msra.mxu1 %v1122_v37  ;;  %1446 = vmatprep.mubr.bf16.mxu1 %v5763_v11  ;;  %v1608_v60 = vsel %vm1596_vm5, %v6362_v40, %v6364_v43  ;;  %v1607_v14 = vsel %vm1596_vm5, %v6344_v35, %v6362_v40  ;;  %v3622_v37 = vld [vmem:[%s7729_s0 + $0x18] sm:$0xff] }
  0xdd   :  { %1719 = vmatprep.subr.bf16.mxu1 %v1626_v30  ;;  %3203 = vrot.lane.b32.xlu0 %v5936_v32, %s5775_s8  ;;  %v1650_v19 = vand.u32 %v1608_v60, %v6000_v41  ;;  %v1647_v26 = vand.u32 %v1607_v14, %v6000_v41  ;;  %v3686_v30 = vcombine.high %v3622_v37, %v3622_v37 }
  0xde   :  { %3205 = vrot.lane.b32.xlu1 %v5941_v33, %s5775_s8  ;;  %v1604_v33 = vsel %vm1596_vm5, %v6319_v20, %v6321_v23 }
  0xdf   :  { %v6388_v48 = vpop.permute.xlu0 %1588  ;;  %5626 = vmatmul.mubr.msk.bf16.vlgmr.msra.gmra.mxu0 %vm171_vm3, %v6129_v63  ;;  %v6392_v32 = vpop.permute.xlu1 %1590  ;;  %v1638_v54 = vand.u32 %v1604_v33, %v6000_v41 }
  0xe0   :  { %1679 = vmatpush1.bf16.msra.mxu0 %v1617_v45  ;;  %1696 = vmatprep.mubr.bf16.mxu0 %v5763_v11  ;;  %v1610_v5 = vsel %vm1596_vm5, %v6388_v48, %v6392_v32  ;;  %v1609_v34 = vsel %vm1596_vm5, %v6364_v43, %v6388_v48  ;;  %v6535_v43 = vrot.slane %v3622_v37, %v5831_v7 }
  0xe1   :  { %1760 = vmatprep.subr.bf16.mxu0 %v1632_v49  ;;  %3712 = vrot.lane.b32.xlu0 %v6377_v31, %s5777_s14  ;;  %v1656_v17 = vand.u32 %v1610_v5, %v6000_v41  ;;  %v1653_v40 = vand.u32 %v1609_v34, %v6000_v41 }
  0xe2   :  { %3714 = vrot.lane.b32.xlu1 %v6383_v46, %s5777_s14 }
  0xe3   :  { %v6414_v10 = vpop.permute.xlu0 %1592  ;;  %v1595_v53 = vpop.permute.xlu1 %1594  ;;  %5627 = vmatmul.mubr.msk.bf16.vlgmr.msra.gmra.mxu1 %vm171_vm3, %v6129_v63  ;;  %v5749_v63 = vld [vmem:[%s7730_s1] ss:$0 sps:$4 sm:$0xff]  }
  0xe4   :  { %1720 = vmatpush1.bf16.msra.mxu1 %v1623_v50  ;;  %1737 = vmatprep.mubr.bf16.mxu1 %v5763_v11  ;;  %v1612_v24 = vsel %vm1596_vm5, %v6414_v10, %v1595_v53  ;;  %v1611_v44 = vsel %vm1596_vm5, %v6392_v32, %v6414_v10  ;;  %v6553_v32 = vcombine.high %v6535_v43, %v6535_v43 }
  0xe5   :  { %1801 = vmatprep.subr.bf16.mxu1 %v1638_v54  ;;  %3710 = vrot.lane.b32.xlu0 %v6354_v36, %s5777_s14  ;;  %v1662_v35 = vand.u32 %v1612_v24, %v6000_v41  ;;  %v1659_v33 = vand.u32 %v1611_v44, %v6000_v41  ;;  %v6559_v50 = vrot.slane %v3686_v30, %v5831_v7 }
  0xe6   :  { %3716 = vrot.lane.b32.xlu1 %v6406_v51, %s5777_s14 }
  0xe7   :  { %v6437_v8 = vpop.permute.xlu0 %2101  ;;  %5630 = vmatmul.mubr.msk.bf16.vlgmr.msra.gmra.mxu0 %vm171_vm3, %v6283_v1  ;;  %v6441_v58 = vpop.permute.xlu1 %2103  ;;  %v6575_v7 = vcombine.high %v6559_v50, %v6559_v50 }
  0xe8   :  { %1761 = vmatpush1.bf16.msra.mxu0 %v1629_v9  ;;  %1778 = vmatprep.mubr.bf16.mxu0 %v5763_v11  ;;  %v2135_v38 = vsel %vm2133_vm6, %v6437_v8, %v6441_v58 }
  0xe9   :  { %1842 = vmatprep.subr.bf16.mxu0 %v1644_v59  ;;  %3718 = vrot.lane.b32.xlu0 %v6426_v56, %s5777_s14  ;;  %v2157_v45 = vand.u32 %v2135_v38, %v6000_v41 }
  0xea   :  { %3628 = vrot.lane.b32.xlu1 %v5749_v63, %s5778_s19 }
  0xeb   :  { %v2100_v2 = vpop.permute.xlu0 %2099  ;;  %v6461_v18 = vpop.permute.xlu1 %2105  ;;  %5631 = vmatmul.mubr.msk.bf16.vlgmr.msra.gmra.mxu1 %vm171_vm3, %v6283_v1 }
  0xec   :  { %1802 = vmatpush1.bf16.msra.mxu1 %v1635_v61  ;;  %1819 = vmatprep.mubr.bf16.mxu1 %v5763_v11  ;;  %v2134_v52 = vsel %vm2133_vm6, %v2100_v2, %v6437_v8  ;;  %v2136_v9 = vsel %vm2133_vm6, %v6441_v58, %v6461_v18  ;;  %v6589_v8 = vld.sshfl [vmem:[%s7729_s0 + $0x20] sm:$0x3 pattern:$0x76325410]  ;;  %s5779_s0 = smov 62  }
  0xed   :  { %1883 = vmatprep.subr.bf16.mxu1 %v1650_v19  ;;  %3720 = vrot.lane.b32.xlu0 %v6452_v15, %s5777_s14  ;;  %v2154_v55 = vand.u32 %v2134_v52, %v6000_v41  ;;  %v2160_v58 = vand.u32 %v2136_v9, %v6000_v41 }
  0xee   :  { %3722 = vrot.lane.b32.xlu1 %v6456_v62, %s5777_s14 }
  0xef   :  { %v6489_v20 = vpop.permute.xlu0 %2107  ;;  %5632 = vmatmul.mubr.msk.bf16.vlgmr.msra.gmra.mxu0 %vm171_vm3, %v6283_v1  ;;  %v6493_v23 = vpop.permute.xlu1 %2017 }
  0xf0   :  { %1843 = vmatpush1.bf16.msra.mxu0 %v1641_v12  ;;  %1860 = vmatprep.mubr.bf16.mxu0 %v5763_v11  ;;  %v2137_v49 = vsel %vm2133_vm6, %v6461_v18, %v6489_v20 }
  0xf1   :  { %1924 = vmatprep.subr.bf16.mxu0 %v1656_v17  ;;  %3724 = vrot.lane.b32.xlu0 %v6477_v6, %s5777_s14  ;;  %v2163_v13 = vand.u32 %v2137_v49, %v6000_v41 }
  0xf2   :  { %3726 = vrot.lane.b32.xlu1 %v6483_v21, %s5777_s14 }
  0xf3   :  { %v2110_v27 = vpop.permute.xlu0 %2109  ;;  %v6514_v28 = vpop.permute.xlu1 %2111  ;;  %5633 = vmatmul.mubr.msk.bf16.vlgmr.msra.gmra.mxu1 %vm171_vm3, %v6283_v1 }
  0xf4   :  { %1884 = vmatpush1.bf16.msra.mxu1 %v1647_v26  ;;  %1901 = vmatprep.mubr.bf16.mxu1 %v5763_v11  ;;  %v2139_v54 = vsel %vm2133_vm6, %v2110_v27, %v6514_v28  ;;  %v2138_v60 = vsel %vm2133_vm6, %v6489_v20, %v2110_v27 }
  0xf5   :  { %1965 = vmatprep.subr.bf16.mxu1 %v1662_v35  ;;  %3728 = vrot.lane.b32.xlu0 %v6502_v25, %s5777_s14  ;;  %v2169_v63 = vand.u32 %v2139_v54, %v6000_v41  ;;  %v2166_v19 = vand.u32 %v2138_v60, %v6000_v41 }
  0xf6   :  { %3730 = vrot.lane.b32.xlu1 %v6508_v29, %s5777_s14 }
  0xf7   :  { %v2114_v47 = vpop.permute.xlu0 %2113  ;;  %5634 = vmatmul.mubr.msk.bf16.vlgmr.msra.gmra.mxu0 %vm171_vm3, %v6283_v1  ;;  %v6543_v48 = vpop.permute.xlu1 %2115 }
  0xf8   :  { %1925 = vmatpush1.bf16.msra.mxu0 %v1653_v40  ;;  %1942 = vmatprep.mubr.bf16.mxu0 %v5763_v11  ;;  %v2141_v59 = vsel %vm2133_vm6, %v2114_v47, %v6543_v48  ;;  %v2140_v3 = vsel %vm2133_vm6, %v6514_v28, %v2114_v47 }
  0xf9   :  { %2215 = vmatprep.subr.bf16.mxu0 %v2157_v45  ;;  %3732 = vrot.lane.b32.xlu0 %v6529_v39, %s5777_s14  ;;  %v2175_v61 = vand.u32 %v2141_v59, %v6000_v41 }
  0xfa   :  { %3734 = vrot.lane.b32.xlu1 %v6535_v43, %s5777_s14 }
  0xfb   :  { %v2118_v10 = vpop.permute.xlu0 %2117  ;;  %v6564_v53 = vpop.permute.xlu1 %2119  ;;  %5635 = vmatmul.mubr.msk.bf16.vlgmr.msra.gmra.mxu1 %vm171_vm3, %v6283_v1 }
  0xfc   :  { %1966 = vmatpush1.bf16.msra.mxu1 %v1659_v33  ;;  %1983 = vmatprep.mubr.bf16.mxu1 %v5763_v11  ;;  %v2143_v18 = vsel %vm2133_vm6, %v2118_v10, %v6564_v53  ;;  %v2142_v14 = vsel %vm2133_vm6, %v6543_v48, %v2118_v10 }
  0xfd   :  { %2256 = vmatprep.subr.bf16.mxu1 %v2163_v13  ;;  %3736 = vrot.lane.b32.xlu0 %v6553_v32, %s5777_s14 }
  0xfe   :  { %3738 = vrot.lane.b32.xlu1 %v6559_v50, %s5777_s14 }
  0xff   :  { %v2122_v16 = vpop.permute.xlu0 %2121  ;;  %5636 = vmatmul.mubr.msk.bf16.vlgmr.msra.gmra.mxu0 %vm171_vm3, %v6283_v1  ;;  %v2124_v57 = vpop.permute.xlu1 %2123 }
 0x100   :  { %2216 = vmatpush1.bf16.msra.mxu0 %v2154_v55  ;;  %2233 = vmatprep.mubr.bf16.mxu0 %v5763_v11  ;;  %v2145_v22 = vsel %vm2133_vm6, %v2122_v16, %v2124_v57  ;;  %v2144_v26 = vsel %vm2133_vm6, %v6564_v53, %v2122_v16 }
 0x101   :  { %2297 = vmatprep.subr.bf16.mxu0 %v2169_v63  ;;  %3740 = vrot.lane.b32.xlu0 %v6575_v7, %s5777_s14  ;;  %v2187_v17 = vand.u32 %v2145_v22, %v6000_v41 }
 0x102   :  { %3742 = vrot.lane.b32.xlu1 %v6589_v8, %s5777_s14 }
 0x103   :  { %v2126_v42 = vpop.permute.xlu0 %2125  ;;  %v2128_v2 = vpop.permute.xlu1 %2127  ;;  %5637 = vmatmul.mubr.msk.bf16.vlgmr.msra.gmra.mxu1 %vm171_vm3, %v6283_v1  ;;  %v2181_v1 = vand.u32 %v2143_v18, %v6000_v41 }
 0x104   :  { %2257 = vmatpush1.bf16.msra.mxu1 %v2160_v58  ;;  %2274 = vmatprep.mubr.bf16.mxu1 %v5763_v11  ;;  %v2146_v37 = vsel %vm2133_vm6, %v2124_v57, %v2126_v42 }
 0x105   :  { %2338 = vmatprep.subr.bf16.mxu1 %v2175_v61  ;;  %4249 = vrot.lane.b32.xlu0 %v6377_v31, %s5779_s0  ;;  %v2172_v31 = vand.u32 %v2140_v3, %v6000_v41 }
 0x106   :  { %4251 = vrot.lane.b32.xlu1 %v6383_v46, %s5779_s0  ;;  %v5753_v46 = vld [vmem:[%s7730_s1] ss:$0 sps:$4 sm:$0xff]   ;;  %s5780_s1 = smov 104  }
 0x107   :  { %v2130_v5 = vpop.permute.xlu0 %2129  ;;  %5640 = vmatmul.mubr.msk.bf16.vlgmr.msra.gmra.mxu0 %vm171_vm3, %v6493_v23  ;;  %v2132_v12 = vpop.permute.xlu1 %2131 }
 0x108   :  { %2298 = vmatpush1.bf16.msra.mxu0 %v2166_v19  ;;  %2315 = vmatprep.mubr.bf16.mxu0 %v5763_v11  ;;  %v2149_v28 = vsel %vm2133_vm6, %v2130_v5, %v2132_v12 }
 0x109   :  { %2379 = vmatprep.subr.bf16.mxu0 %v2181_v1  ;;  %4247 = vrot.lane.b32.xlu0 %v6354_v36, %s5779_s0  ;;  %v2147_v36 = vsel %vm2133_vm6, %v2126_v42, %v2128_v2  ;;  %v2199_v38 = vand.u32 %v2149_v28, %v6000_v41 }
 0x10a   :  { %4253 = vrot.lane.b32.xlu1 %v6406_v51, %s5779_s0  ;;  %v2178_v51 = vand.u32 %v2142_v14, %v6000_v41  ;;  %v2193_v34 = vand.u32 %v2147_v36, %v6000_v41 }
 0x10b   :  { %v2639_v20 = vpop.permute.xlu0 %2638  ;;  %v2641_v24 = vpop.permute.xlu1 %2640  ;;  %5641 = vmatmul.mubr.msk.bf16.vlgmr.msra.gmra.mxu1 %vm171_vm3, %v6493_v23 }
 0x10c   :  { %2339 = vmatpush1.bf16.msra.mxu1 %v2172_v31  ;;  %2356 = vmatprep.mubr.bf16.mxu1 %v5763_v11  ;;  %v2672_v44 = vsel %vm2670_vm7, %v2639_v20, %v2641_v24 }
 0x10d   :  { %2420 = vmatprep.subr.bf16.mxu1 %v2187_v17  ;;  %4255 = vrot.lane.b32.xlu0 %v6426_v56, %s5779_s0  ;;  %v2184_v56 = vand.u32 %v2144_v26, %v6000_v41  ;;  %v2694_v45 = vand.u32 %v2672_v44, %v6000_v41 }
 0x10e   :  { %4165 = vrot.lane.b32.xlu1 %v5753_v46, %s5780_s1 }
 0x10f   :  { %v2637_v35 = vpop.permute.xlu0 %2636  ;;  %5642 = vmatmul.mubr.msk.bf16.vlgmr.msra.gmra.mxu0 %vm171_vm3, %v6493_v23  ;;  %v2643_v27 = vpop.permute.xlu1 %2642 }
 0x110   :  { %2380 = vmatpush1.bf16.msra.mxu0 %v2178_v51  ;;  %2397 = vmatprep.mubr.bf16.mxu0 %v5763_v11  ;;  %v2671_v33 = vsel %vm2670_vm7, %v2637_v35, %v2639_v20  ;;  %v2673_v54 = vsel %vm2670_vm7, %v2641_v24, %v2643_v27 }
 0x111   :  { %2461 = vmatprep.subr.bf16.mxu0 %v2193_v34  ;;  %4257 = vrot.lane.b32.xlu0 %v6452_v15, %s5779_s0  ;;  %v2190_v15 = vand.u32 %v2146_v37, %v6000_v41 }
 0x112   :  { %4259 = vrot.lane.b32.xlu1 %v6456_v62, %s5779_s0  ;;  %v2148_v62 = vsel %vm2133_vm6, %v2128_v2, %v2130_v5 }
 0x113   :  { %v2645_v40 = vpop.permute.xlu0 %2644  ;;  %v6651_v30 = vpop.permute.xlu1 %2554  ;;  %5643 = vmatmul.mubr.msk.bf16.vlgmr.msra.gmra.mxu1 %vm171_vm3, %v6493_v23 }
 0x114   :  { %2421 = vmatpush1.bf16.msra.mxu1 %v2184_v56  ;;  %2438 = vmatprep.mubr.bf16.mxu1 %v5763_v11  ;;  %v2674_v49 = vsel %vm2670_vm7, %v2643_v27, %v2645_v40 }
 0x115   :  { %2502 = vmatprep.subr.bf16.mxu1 %v2199_v38  ;;  %4261 = vrot.lane.b32.xlu0 %v6477_v6, %s5779_s0  ;;  %v2196_v6 = vand.u32 %v2148_v62, %v6000_v41  ;;  %v2700_v52 = vand.u32 %v2674_v49, %v6000_v41 }
 0x116   :  { %4263 = vrot.lane.b32.xlu1 %v6483_v21, %s5779_s0 }
 0x117   :  { %v2647_v47 = vpop.permute.xlu0 %2646  ;;  %5644 = vmatmul.mubr.msk.bf16.vlgmr.msra.gmra.mxu0 %vm171_vm3, %v6493_v23  ;;  %v2649_v48 = vpop.permute.xlu1 %2648 }
 0x118   :  { %2462 = vmatpush1.bf16.msra.mxu0 %v2190_v15  ;;  %2479 = vmatprep.mubr.bf16.mxu0 %v5763_v11  ;;  %v2676_v21 = vsel %vm2670_vm7, %v2647_v47, %v2649_v48  ;;  %v2675_v16 = vsel %vm2670_vm7, %v2645_v40, %v2647_v47 }
 0x119   :  { %2752 = vmatprep.subr.bf16.mxu0 %v2694_v45  ;;  %4265 = vrot.lane.b32.xlu0 %v6502_v25, %s5779_s0  ;;  %v2706_v25 = vand.u32 %v2676_v21, %v6000_v41 }
 0x11a   :  { %4267 = vrot.lane.b32.xlu1 %v6508_v29, %s5779_s0  ;;  %v2691_v29 = vand.u32 %v2671_v33, %v6000_v41 }
 0x11b   :  { %v2651_v13 = vpop.permute.xlu0 %2650  ;;  %v2653_v10 = vpop.permute.xlu1 %2652  ;;  %5645 = vmatmul.mubr.msk.bf16.vlgmr.msra.gmra.mxu1 %vm171_vm3, %v6493_v23 }
 0x11c   :  { %2503 = vmatpush1.bf16.msra.mxu1 %v2196_v6  ;;  %2520 = vmatprep.mubr.bf16.mxu1 %v5763_v11  ;;  %v2678_v53 = vsel %vm2670_vm7, %v2651_v13, %v2653_v10  ;;  %v2677_v60 = vsel %vm2670_vm7, %v2649_v48, %v2651_v13 }
 0x11d   :  { %2793 = vmatprep.subr.bf16.mxu1 %v2700_v52  ;;  %4269 = vrot.lane.b32.xlu0 %v6529_v39, %s5779_s0  ;;  %v2712_v63 = vand.u32 %v2678_v53, %v6000_v41  ;;  %v2697_v39 = vand.u32 %v2673_v54, %v6000_v41 }
 0x11e   :  { %4271 = vrot.lane.b32.xlu1 %v6535_v43, %s5779_s0 }
 0x11f   :  { %v2655_v55 = vpop.permute.xlu0 %2654  ;;  %5646 = vmatmul.mubr.msk.bf16.vlgmr.msra.gmra.mxu0 %vm171_vm3, %v6493_v23  ;;  %v2657_v9 = vpop.permute.xlu1 %2656 }
 0x120   :  { %2753 = vmatpush1.bf16.msra.mxu0 %v2691_v29  ;;  %2770 = vmatprep.mubr.bf16.mxu0 %v5763_v11  ;;  %v2680_v43 = vsel %vm2670_vm7, %v2655_v55, %v2657_v9  ;;  %v2679_v18 = vsel %vm2670_vm7, %v2653_v10, %v2655_v55 }
 0x121   :  { %2834 = vmatprep.subr.bf16.mxu0 %v2706_v25  ;;  %4273 = vrot.lane.b32.xlu0 %v6553_v32, %s5779_s0  ;;  %v2718_v58 = vand.u32 %v2680_v43, %v6000_v41  ;;  %v2703_v32 = vand.u32 %v2675_v16, %v6000_v41  ;;  %v2715_v1 = vand.u32 %v2679_v18, %v6000_v41 }
 0x122   :  { %4275 = vrot.lane.b32.xlu1 %v6559_v50, %s5779_s0 }
 0x123   :  { %v2659_v57 = vpop.permute.xlu0 %2658  ;;  %v2661_v59 = vpop.permute.xlu1 %2660  ;;  %5647 = vmatmul.mubr.msk.bf16.vlgmr.msra.gmra.mxu1 %vm171_vm3, %v6493_v23 }
 0x124   :  { %2794 = vmatpush1.bf16.msra.mxu1 %v2697_v39  ;;  %2811 = vmatprep.mubr.bf16.mxu1 %v5763_v11  ;;  %v2682_v50 = vsel %vm2670_vm7, %v2659_v57, %v2661_v59  ;;  %v2681_v12 = vsel %vm2670_vm7, %v2657_v9, %v2659_v57 }
 0x125   :  { %2875 = vmatprep.subr.bf16.mxu1 %v2712_v63  ;;  %4277 = vrot.lane.b32.xlu0 %v6575_v7, %s5779_s0  ;;  %v2724_v42 = vand.u32 %v2682_v50, %v6000_v41  ;;  %v2709_v7 = vand.u32 %v2677_v60, %v6000_v41  ;;  %v2721_v14 = vand.u32 %v2681_v12, %v6000_v41 }
 0x126   :  { %4279 = vrot.lane.b32.xlu1 %v6589_v8, %s5779_s0 }
 0x127   :  { %v2663_v61 = vpop.permute.xlu0 %2662  ;;  %5650 = vmatmul.mubr.msk.bf16.vlgmr.msra.gmra.mxu0 %vm171_vm3, %v6651_v30  ;;  %v2665_v23 = vpop.permute.xlu1 %2664 }
 0x128   :  { %2835 = vmatpush1.bf16.msra.mxu0 %v2703_v32  ;;  %2852 = vmatprep.mubr.bf16.mxu0 %v5763_v11  ;;  %v2684_v2 = vsel %vm2670_vm7, %v2663_v61, %v2665_v23  ;;  %v2683_v20 = vsel %vm2670_vm7, %v2661_v59, %v2663_v61 }
 0x129   :  { %2916 = vmatprep.subr.bf16.mxu0 %v2718_v58  ;;  %v2730_v3 = vand.u32 %v2684_v2, %v6000_v41  ;;  %v2727_v26 = vand.u32 %v2683_v20, %v6000_v41  ;;  %v4693_v2 = vld [vmem:[%s7731_s2] sm:$0xff] }
 0x12a   :  { %4696 = vperm.xlu0 %5737, %v4693_v2  }
 0x12b   :  { %v2667_v8 = vpop.permute.xlu0 %2666  ;;  %5651 = vmatmul.mubr.msk.bf16.vlgmr.msra.gmra.mxu1 %vm171_vm3, %v6651_v30 }
 0x12c   :  { %v2669_v19 = vpop.permute.xlu1 %2668  ;;  %2876 = vmatpush1.bf16.msra.mxu1 %v2709_v7  ;;  %2893 = vmatprep.mubr.bf16.mxu1 %v5763_v11  ;;  %v2685_v34 = vsel %vm2670_vm7, %v2665_v23, %v2667_v8 }
 0x12d   :  { %2957 = vmatprep.subr.bf16.mxu1 %v2724_v42  ;;  %v2686_v5 = vsel %vm2670_vm7, %v2667_v8, %v2669_v19  ;;  %v2733_v37 = vand.u32 %v2685_v34, %v6000_v41 }
 0x12e   :  { %v2736_v46 = vand.u32 %v2686_v5, %v6000_v41 }
 0x12f   :  { %v3176_v22 = vpop.permute.xlu0 %3175  ;;  %5652 = vmatmul.mubr.msk.bf16.vlgmr.msra.gmra.mxu0 %vm171_vm3, %v6651_v30 }
 0x130   :  { %2917 = vmatpush1.bf16.msra.mxu0 %v2715_v1  ;;  %v3178_v31 = vpop.permute.xlu1 %3177  ;;  %2934 = vmatprep.mubr.bf16.mxu0 %v5763_v11 }
 0x131   :  { %2998 = vmatprep.subr.bf16.mxu0 %v2730_v3  ;;  %v3209_v17 = vsel %vm3207_vm8, %v3176_v22, %v3178_v31 }
 0x132   :  { %v3231_v51 = vand.u32 %v3209_v17, %v6000_v41 }
 0x133   :  { %v3174_v24 = vpop.permute.xlu0 %3173  ;;  %5653 = vmatmul.mubr.msk.bf16.vlgmr.msra.gmra.mxu1 %vm171_vm3, %v6651_v30 }
 0x134   :  { %v3180_v36 = vpop.permute.xlu1 %3179  ;;  %2958 = vmatpush1.bf16.msra.mxu1 %v2721_v14  ;;  %2975 = vmatprep.mubr.bf16.mxu1 %v5763_v11  ;;  %v3208_v38 = vsel %vm3207_vm8, %v3174_v24, %v3176_v22 }
 0x135   :  { %3039 = vmatprep.subr.bf16.mxu1 %v2736_v46  ;;  %v3228_v62 = vand.u32 %v3208_v38, %v6000_v41  ;;  %v3210_v47 = vsel %vm3207_vm8, %v3178_v31, %v3180_v36 }
 0x136   :  { %v3234_v21 = vand.u32 %v3210_v47, %v6000_v41 }
 0x137   :  { %v3182_v35 = vpop.permute.xlu0 %3181  ;;  %5654 = vmatmul.mubr.msk.bf16.vlgmr.msra.gmra.mxu0 %vm171_vm3, %v6651_v30 }
 0x138   :  { %v3211_v27 = vsel %vm3207_vm8, %v3180_v36, %v3182_v35  ;;  %2999 = vmatpush1.bf16.msra.mxu0 %v2727_v26  ;;  %v6739_v28 = vpop.permute.xlu1 %3091  ;;  %3016 = vmatprep.mubr.bf16.mxu0 %v5763_v11 }
 0x139   :  { %v3237_v56 = vand.u32 %v3211_v27, %v6000_v41  ;;  %3289 = vmatprep.subr.bf16.mxu0 %v3231_v51 }
 0x13b   :  { %v3184_v40 = vpop.permute.xlu0 %3183  ;;  %5655 = vmatmul.mubr.msk.bf16.vlgmr.msra.gmra.mxu1 %vm171_vm3, %v6651_v30 }
 0x13c   :  { %v3186_v44 = vpop.permute.xlu1 %3185  ;;  %3040 = vmatpush1.bf16.msra.mxu1 %v2733_v37  ;;  %3057 = vmatprep.mubr.bf16.mxu1 %v5763_v11  ;;  %v3212_v52 = vsel %vm3207_vm8, %v3182_v35, %v3184_v40 }
 0x13d   :  { %v3213_v15 = vsel %vm3207_vm8, %v3184_v40, %v3186_v44  ;;  %3330 = vmatprep.subr.bf16.mxu1 %v3237_v56  ;;  %v3240_v29 = vand.u32 %v3212_v52, %v6000_v41 }
 0x13e   :  { %v3243_v45 = vand.u32 %v3213_v15, %v6000_v41 }
 0x13f   :  { %v3188_v48 = vpop.permute.xlu0 %3187  ;;  %5656 = vmatmul.mubr.msk.bf16.vlgmr.msra.gmra.mxu0 %vm171_vm3, %v6651_v30 }
 0x140   :  { %3290 = vmatpush1.bf16.msra.mxu0 %v3228_v62  ;;  %v3190_v49 = vpop.permute.xlu1 %3189  ;;  %3307 = vmatprep.mubr.bf16.mxu0 %v5763_v11  ;;  %v3214_v54 = vsel %vm3207_vm8, %v3186_v44, %v3188_v48 }
 0x141   :  { %v3215_v6 = vsel %vm3207_vm8, %v3188_v48, %v3190_v49  ;;  %3371 = vmatprep.subr.bf16.mxu0 %v3243_v45  ;;  %v3246_v43 = vand.u32 %v3214_v54, %v6000_v41 }
 0x142   :  { %v3249_v33 = vand.u32 %v3215_v6, %v6000_v41 }
 0x143   :  { %v3192_v13 = vpop.permute.xlu0 %3191  ;;  %5657 = vmatmul.mubr.msk.bf16.vlgmr.msra.gmra.mxu1 %vm171_vm3, %v6651_v30 }
 0x144   :  { %v3194_v10 = vpop.permute.xlu1 %3193  ;;  %3331 = vmatpush1.bf16.msra.mxu1 %v3234_v21  ;;  %3348 = vmatprep.mubr.bf16.mxu1 %v5763_v11  ;;  %v3216_v57 = vsel %vm3207_vm8, %v3190_v49, %v3192_v13 }
 0x145   :  { %v3217_v25 = vsel %vm3207_vm8, %v3192_v13, %v3194_v10  ;;  %3412 = vmatprep.subr.bf16.mxu1 %v3249_v33  ;;  %v3252_v23 = vand.u32 %v3216_v57, %v6000_v41 }
 0x146   :  { %v3255_v53 = vand.u32 %v3217_v25, %v6000_v41 }
 0x147   :  { %v6766_v55 = vpop.f32.mrf.mxu0  ;;  %v3196_v9 = vpop.permute.xlu0 %3195  ;;  %5660 = vmatmul.mubr.msk.bf16.vlgmr.msra.gmra.mxu0 %vm171_vm3, %v6739_v28 }
 0x148   :  { %3372 = vmatpush1.bf16.msra.mxu0 %v3240_v29  ;;  %v3198_v30 = vpop.permute.xlu1 %3197  ;;  %3389 = vmatprep.mubr.bf16.mxu0 %v5763_v11  ;;  %v3218_v18 = vsel %vm3207_vm8, %v3194_v10, %v3196_v9 }
 0x149   :  { %v3219_v63 = vsel %vm3207_vm8, %v3196_v9, %v3198_v30  ;;  %v6772_v39 = vpop.f32.mrf.mxu0  ;;  %3453 = vmatprep.subr.bf16.mxu0 %v3255_v53  ;;  %v3258_v22 = vand.u32 %v3218_v18, %v6000_v41 }
 0x14a   :  { %v3261_v16 = vand.u32 %v3219_v63, %v6000_v41 }
 0x14b   :  { %v265_v59 = vpop.f32.mrf.mxu0  ;;  %v3200_v58 = vpop.permute.xlu0 %3199  ;;  %5661 = vmatmul.mubr.msk.bf16.vlgmr.msra.gmra.mxu1 %vm171_vm3, %v6739_v28 }
 0x14c   :  { %v6779_v32 = vpop.f32.mrf.mxu1  ;;  %v3202_v50 = vpop.permute.xlu1 %3201  ;;  %3413 = vmatpush1.bf16.msra.mxu1 %v3246_v43  ;;  %3430 = vmatprep.mubr.bf16.mxu1 %v5763_v11  ;;  %v3220_v14 = vsel %vm3207_vm8, %v3198_v30, %v3200_v58 }
 0x14d   :  { %v3221_v60 = vsel %vm3207_vm8, %v3200_v58, %v3202_v50  ;;  %v266_v61 = vpop.f32.mrf.mxu0  ;;  %3494 = vmatprep.subr.bf16.mxu1 %v3261_v16  ;;  %v3264_v34 = vand.u32 %v3220_v14, %v6000_v41 }
 0x14e   :  { %v3267_v42 = vand.u32 %v3221_v60, %v6000_v41  ;;  %v6785_v7 = vpop.f32.mrf.mxu1 }
 0x14f   :  { %v3204_v8 = vpop.permute.xlu0 %3203  ;;  %v6791_v19 = vpop.f32.mrf.mxu0  ;;  %5662 = vmatmul.mubr.msk.bf16.vlgmr.msra.gmra.mxu0 %vm171_vm3, %v6739_v28 }
 0x150   :  { %v306_v3 = vpop.f32.mrf.mxu1  ;;  %3454 = vmatpush1.bf16.msra.mxu0 %v3252_v23  ;;  %v3206_v1 = vpop.permute.xlu1 %3205  ;;  %3471 = vmatprep.mubr.bf16.mxu0 %v5763_v11  ;;  %v3222_v56 = vsel %vm3207_vm8, %v3202_v50, %v3204_v8 }
 0x151   :  { %v3223_v5 = vsel %vm3207_vm8, %v3204_v8, %v3206_v1  ;;  %v6797_v12 = vpop.f32.mrf.mxu0  ;;  %3535 = vmatprep.subr.bf16.mxu0 %v3267_v42  ;;  %v3270_v62 = vand.u32 %v3222_v56, %v6000_v41 }
 0x152   :  { %v3273_v31 = vand.u32 %v3223_v5, %v6000_v41  ;;  %v307_v46 = vpop.f32.mrf.mxu1 }
 0x153   :  { %v3713_v17 = vpop.permute.xlu0 %3712  ;;  %v347_v20 = vpop.f32.mrf.mxu0  ;;  %5663 = vmatmul.mubr.msk.bf16.vlgmr.msra.gmra.mxu1 %vm171_vm3, %v6739_v28 }
 0x154   :  { %v6804_v24 = vpop.f32.mrf.mxu1  ;;  %v3715_v36 = vpop.permute.xlu1 %3714  ;;  %3495 = vmatpush1.bf16.msra.mxu1 %v3258_v22  ;;  %3512 = vmatprep.mubr.bf16.mxu1 %v5763_v11 }
 0x155   :  { %v3746_v51 = vsel %vm3744_vm9, %v3713_v17, %v3715_v36  ;;  %v348_v26 = vpop.f32.mrf.mxu0  ;;  %3576 = vmatprep.subr.bf16.mxu1 %v3273_v31 }
 0x156   :  { %v3768_v35 = vand.u32 %v3746_v51, %v6000_v41  ;;  %v6810_v27 = vpop.f32.mrf.mxu1 }
 0x157   :  { %v3711_v37 = vpop.permute.xlu0 %3710  ;;  %v6813_v38 = vpop.f32.mrf.mxu0  ;;  %5664 = vmatmul.mubr.msk.bf16.vlgmr.msra.gmra.mxu0 %vm171_vm3, %v6739_v28 }
 0x158   :  { %v388_v40 = vpop.f32.mrf.mxu1  ;;  %3536 = vmatpush1.bf16.msra.mxu0 %v3264_v34  ;;  %v3717_v44 = vpop.permute.xlu1 %3716  ;;  %3553 = vmatprep.mubr.bf16.mxu0 %v5763_v11  ;;  %v3745_v47 = vsel %vm3744_vm9, %v3711_v37, %v3713_v17 }
 0x159   :  { %v6818_v15 = vpop.f32.mrf.mxu0  ;;  %3826 = vmatprep.subr.bf16.mxu0 %v3768_v35  ;;  %v3765_v10 = vand.u32 %v3745_v47, %v6000_v41  ;;  %v3747_v29 = vsel %vm3744_vm9, %v3715_v36, %v3717_v44 }
 0x15a   :  { %v389_v45 = vpop.f32.mrf.mxu1  ;;  %v3771_v16 = vand.u32 %v3747_v29, %v6000_v41 }
 0x15b   :  { %v3719_v48 = vpop.permute.xlu0 %3718  ;;  %v429_v49 = vpop.f32.mrf.mxu0  ;;  %5665 = vmatmul.mubr.msk.bf16.vlgmr.msra.gmra.mxu1 %vm171_vm3, %v6739_v28 }
 0x15c   :  { %v3748_v6 = vsel %vm3744_vm9, %v3717_v44, %v3719_v48  ;;  %v6825_v21 = vpop.f32.mrf.mxu1  ;;  %v6827_v33 = vpop.permute.xlu1 %3628  ;;  %3577 = vmatpush1.bf16.msra.mxu1 %v3270_v62  ;;  %3594 = vmatprep.mubr.bf16.mxu1 %v5763_v11 }
 0x15d   :  { %v3774_v52 = vand.u32 %v3748_v6, %v6000_v41  ;;  %v430_v13 = vpop.f32.mrf.mxu0 }
 0x15e   :  { %v6832_v25 = vpop.f32.mrf.mxu1 }
 0x15f   :  { %v3721_v53 = vpop.permute.xlu0 %3720  ;;  %v6835_v54 = vpop.f32.mrf.mxu0  ;;  %5666 = vmatmul.mubr.msk.bf16.vlgmr.msra.gmra.mxu0 %vm171_vm3, %v6739_v28  ;;  %3867 = vmatprep.subr.bf16.mxu1 %v3774_v52 }
 0x160   :  { %v470_v9 = vpop.f32.mrf.mxu1  ;;  %3827 = vmatpush1.bf16.msra.mxu0 %v3765_v10  ;;  %v3723_v30 = vpop.permute.xlu1 %3722  ;;  %3844 = vmatprep.mubr.bf16.mxu0 %v5763_v11  ;;  %v3749_v58 = vsel %vm3744_vm9, %v3719_v48, %v3721_v53 }
 0x161   :  { %v3750_v63 = vsel %vm3744_vm9, %v3721_v53, %v3723_v30  ;;  %v6841_v43 = vpop.f32.mrf.mxu0  ;;  %v3777_v18 = vand.u32 %v3749_v58, %v6000_v41 }
 0x162   :  { %v3780_v57 = vand.u32 %v3750_v63, %v6000_v41  ;;  %v471_v59 = vpop.f32.mrf.mxu1 }
 0x163   :  { %v3725_v50 = vpop.permute.xlu0 %3724  ;;  %v511_v60 = vpop.f32.mrf.mxu0  ;;  %5667 = vmatmul.mubr.msk.bf16.vlgmr.msra.gmra.mxu1 %vm171_vm3, %v6739_v28 }
 0x164   :  { %v6848_v61 = vpop.f32.mrf.mxu1  ;;  %v3727_v23 = vpop.permute.xlu1 %3726  ;;  %3868 = vmatpush1.bf16.msra.mxu1 %v3771_v16  ;;  %3908 = vmatprep.subr.bf16.mxu0 %v3780_v57  ;;  %v3751_v1 = vsel %vm3744_vm9, %v3723_v30, %v3725_v50 }
 0x165   :  { %v3752_v42 = vsel %vm3744_vm9, %v3725_v50, %v3727_v23  ;;  %v512_v2 = vpop.f32.mrf.mxu0  ;;  %3885 = vmatprep.mubr.bf16.mxu1 %v5763_v11  ;;  %v3783_v20 = vand.u32 %v3751_v1, %v6000_v41 }
 0x166   :  { %v3786_v8 = vand.u32 %v3752_v42, %v6000_v41  ;;  %v6854_v3 = vpop.f32.mrf.mxu1 }
 0x167   :  { %v3729_v5 = vpop.permute.xlu0 %3728  ;;  %v640_v28 = vpop.f32.mrf.mxu0  ;;  %5670 = vmatmul.mubr.msk.bf16.vlgmr.msra.gmra.mxu0 %vm171_vm3, %v6827_v33 }
 0x168   :  { %v552_v22 = vpop.f32.mrf.mxu1  ;;  %v6860_v31 = vadd.f32 %v640_v28, %v6766_v55  ;;  %3909 = vmatpush1.bf16.msra.mxu0 %v3777_v18  ;;  %v3731_v46 = vpop.permute.xlu1 %3730  ;;  %3949 = vmatprep.subr.bf16.mxu1 %v3786_v8  ;;  %v3753_v34 = vsel %vm3744_vm9, %v3727_v23, %v3729_v5 }
 0x169   :  { %v3754_v14 = vsel %vm3744_vm9, %v3729_v5, %v3731_v46  ;;  %v642_v17 = vpop.f32.mrf.mxu0  ;;  %3926 = vmatprep.mubr.bf16.mxu0 %v5763_v11 }
 0x16a   :  { %v3792_v36 = vand.u32 %v3754_v14, %v6000_v41  ;;  %v553_v51 = vpop.f32.mrf.mxu1  ;;  %v6867_v26 = vadd.f32 %v642_v17, %v6772_v39  ;;  %v3789_v39 = vand.u32 %v3753_v34, %v6000_v41 }
 0x16b   :  { %v3733_v55 = vpop.permute.xlu0 %3732  ;;  %v644_v35 = vpop.f32.mrf.mxu0  ;;  %5671 = vmatmul.mubr.msk.bf16.vlgmr.msra.gmra.mxu1 %vm171_vm3, %v6827_v33 }
 0x16c   :  { %v3735_v56 = vpop.permute.xlu1 %3734  ;;  %v681_v37 = vpop.f32.mrf.mxu1  ;;  %3950 = vmatpush1.bf16.msra.mxu1 %v3783_v20  ;;  %3990 = vmatprep.subr.bf16.mxu0 %v3792_v36  ;;  %v3755_v48 = vsel %vm3744_vm9, %v3731_v46, %v3733_v55 }
 0x16d   :  { %v3756_v40 = vsel %vm3744_vm9, %v3733_v55, %v3735_v56  ;;  %v6874_v44 = vadd.f32 %v681_v37, %v6779_v32  ;;  %v645_v62 = vpop.f32.mrf.mxu0  ;;  %3967 = vmatprep.mubr.bf16.mxu1 %v5763_v11 }
 0x16e   :  { %v3798_v45 = vand.u32 %v3756_v40, %v6000_v41  ;;  %v683_v47 = vpop.f32.mrf.mxu1 }
 0x16f   :  { %v6881_v49 = vadd.f32 %v683_v47, %v6785_v7  ;;  %v3737_v6 = vpop.permute.xlu0 %3736  ;;  %v722_v52 = vpop.f32.mrf.mxu0  ;;  %5672 = vmatmul.mubr.msk.bf16.vlgmr.msra.gmra.mxu0 %vm171_vm3, %v6827_v33  ;;  %v3795_v7 = vand.u32 %v3755_v48, %v6000_v41 }
 0x170   :  { %v6886_v32 = vadd.f32 %v722_v52, %v6791_v19  ;;  %3991 = vmatpush1.bf16.msra.mxu0 %v3789_v39  ;;  %v3739_v13 = vpop.permute.xlu1 %3738  ;;  %v685_v10 = vpop.f32.mrf.mxu1  ;;  %4031 = vmatprep.subr.bf16.mxu1 %v3798_v45  ;;  %v3757_v19 = vsel %vm3744_vm9, %v3735_v56, %v3737_v6 }
 0x171   :  { %v3758_v29 = vsel %vm3744_vm9, %v3737_v6, %v3739_v13  ;;  %v724_v53 = vpop.f32.mrf.mxu0  ;;  %4008 = vmatprep.mubr.bf16.mxu0 %v5763_v11 }
 0x172   :  { %v3804_v9 = vand.u32 %v3758_v29, %v6000_v41  ;;  %v686_v30 = vpop.f32.mrf.mxu1  ;;  %v6893_v63 = vadd.f32 %v724_v53, %v6797_v12  ;;  %v3801_v12 = vand.u32 %v3757_v19, %v6000_v41 }
 0x173   :  { %v3741_v16 = vpop.permute.xlu0 %3740  ;;  %v726_v57 = vpop.f32.mrf.mxu0  ;;  %5673 = vmatmul.mubr.msk.bf16.vlgmr.msra.gmra.mxu1 %vm171_vm3, %v6827_v33 }
 0x174   :  { %v3743_v59 = vpop.permute.xlu1 %3742  ;;  %v763_v58 = vpop.f32.mrf.mxu1  ;;  %4032 = vmatpush1.bf16.msra.mxu1 %v3795_v7  ;;  %4072 = vmatprep.subr.bf16.mxu0 %v3804_v9  ;;  %v3759_v18 = vsel %vm3744_vm9, %v3739_v13, %v3741_v16 }
 0x175   :  { %v3760_v50 = vsel %vm3744_vm9, %v3741_v16, %v3743_v59  ;;  %v6900_v60 = vadd.f32 %v763_v58, %v6804_v24  ;;  %v727_v23 = vpop.f32.mrf.mxu0  ;;  %4049 = vmatprep.mubr.bf16.mxu1 %v5763_v11 }
 0x176   :  { %v3810_v42 = vand.u32 %v3760_v50, %v6000_v41  ;;  %v765_v2 = vpop.f32.mrf.mxu1 }
 0x177   :  { %v6907_v8 = vadd.f32 %v765_v2, %v6810_v27  ;;  %v4250_v1 = vpop.permute.xlu0 %4249  ;;  %v804_v5 = vpop.f32.mrf.mxu0  ;;  %5674 = vmatmul.mubr.msk.bf16.vlgmr.msra.gmra.mxu0 %vm171_vm3, %v6827_v33  ;;  %v3807_v27 = vand.u32 %v3759_v18, %v6000_v41 }
 0x178   :  { %v6912_v24 = vadd.f32 %v804_v5, %v6813_v38  ;;  %4073 = vmatpush1.bf16.msra.mxu0 %v3801_v12  ;;  %v4252_v28 = vpop.permute.xlu1 %4251  ;;  %v767_v22 = vpop.f32.mrf.mxu1  ;;  %4113 = vmatprep.subr.bf16.mxu1 %v3810_v42 }
 0x179   :  { %v4283_v46 = vsel %vm4281_vm10, %v4250_v1, %v4252_v28  ;;  %v806_v14 = vpop.f32.mrf.mxu0  ;;  %4090 = vmatprep.mubr.bf16.mxu0 %v5763_v11 }
 0x17a   :  { %v4305_v17 = vand.u32 %v4283_v46, %v6000_v41  ;;  %v768_v20 = vpop.f32.mrf.mxu1  ;;  %v6919_v36 = vadd.f32 %v806_v14, %v6818_v15 }
 0x17b   :  { %v4248_v51 = vpop.permute.xlu0 %4247  ;;  %v808_v38 = vpop.f32.mrf.mxu0  ;;  %5675 = vmatmul.mubr.msk.bf16.vlgmr.msra.gmra.mxu1 %vm171_vm3, %v6827_v33 }
 0x17c   :  { %v4282_v34 = vsel %vm4281_vm10, %v4248_v51, %v4250_v1  ;;  %v4254_v55 = vpop.permute.xlu1 %4253  ;;  %v845_v35 = vpop.f32.mrf.mxu1  ;;  %4114 = vmatpush1.bf16.msra.mxu1 %v3807_v27  ;;  %4363 = vmatprep.subr.bf16.mxu0 %v4305_v17 }
 0x17d   :  { %v4302_v56 = vand.u32 %v4282_v34, %v6000_v41  ;;  %v6926_v37 = vadd.f32 %v845_v35, %v6825_v21  ;;  %v809_v40 = vpop.f32.mrf.mxu0  ;;  %4131 = vmatprep.mubr.bf16.mxu1 %v5763_v11  ;;  %v4284_v62 = vsel %vm4281_vm10, %v4252_v28, %v4254_v55 }
 0x17e   :  { %v847_v15 = vpop.f32.mrf.mxu1  ;;  %v4308_v10 = vand.u32 %v4284_v62, %v6000_v41 }
 0x17f   :  { %v6931_v39 = vadd.f32 %v847_v15, %v6832_v25  ;;  %v4256_v45 = vpop.permute.xlu0 %4255  ;;  %v886_v47 = vpop.f32.mrf.mxu0  ;;  %5676 = vmatmul.mubr.msk.bf16.vlgmr.msra.gmra.mxu0 %vm171_vm3, %v6827_v33 }
 0x180   :  { %v4285_v48 = vsel %vm4281_vm10, %v4254_v55, %v4256_v45  ;;  %v6937_v6 = vadd.f32 %v886_v47, %v6835_v54  ;;  %4364 = vmatpush1.bf16.msra.mxu0 %v4302_v56  ;;  %v6939_v21 = vpop.permute.xlu1 %4165  ;;  %v849_v52 = vpop.f32.mrf.mxu1  ;;  %4381 = vmatprep.mubr.bf16.mxu0 %v5763_v11 }
 0x181   :  { %v4311_v13 = vand.u32 %v4285_v48, %v6000_v41  ;;  %v888_v25 = vpop.f32.mrf.mxu0 }
 0x182   :  { %v850_v29 = vpop.f32.mrf.mxu1  ;;  %v6945_v53 = vadd.f32 %v888_v25, %v6841_v43 }
 0x183   :  { %v4258_v7 = vpop.permute.xlu0 %4257  ;;  %v890_v9 = vpop.f32.mrf.mxu0  ;;  %5677 = vmatmul.mubr.msk.bf16.vlgmr.msra.gmra.mxu1 %vm171_vm3, %v6827_v33  ;;  %4404 = vmatprep.subr.bf16.mxu1 %v4311_v13 }
 0x184   :  { %v4286_v54 = vsel %vm4281_vm10, %v4256_v45, %v4258_v7  ;;  %v4260_v30 = vpop.permute.xlu1 %4259  ;;  %v927_v19 = vpop.f32.mrf.mxu1  ;;  %4405 = vmatpush1.bf16.msra.mxu1 %v4308_v10  ;;  %4422 = vmatprep.mubr.bf16.mxu1 %v5763_v11 }
 0x185   :  { %v4314_v16 = vand.u32 %v4286_v54, %v6000_v41  ;;  %v4287_v57 = vsel %vm4281_vm10, %v4258_v7, %v4260_v30  ;;  %v6954_v43 = vadd.f32 %v927_v19, %v6848_v61  ;;  %v891_v59 = vpop.f32.mrf.mxu0 }
 0x186   :  { %v4317_v58 = vand.u32 %v4287_v57, %v6000_v41  ;;  %v929_v50 = vpop.f32.mrf.mxu1 }
 0x187   :  { %v6958_v33 = vadd.f32 %v929_v50, %v6854_v3  ;;  %v4262_v23 = vpop.permute.xlu0 %4261  ;;  %v1161_v12 = vpop.f32.mrf.mxu0  ;;  %5680 = vmatmul.mubr.msk.bf16.vlgmr.msra.gmra.mxu0 %vm171_vm3, %v6939_v21 }
 0x188   :  { %v4288_v42 = vsel %vm4281_vm10, %v4260_v30, %v4262_v23  ;;  %v6964_v2 = vadd.f32 %v1161_v12, %v6860_v31  ;;  %4445 = vmatprep.subr.bf16.mxu0 %v4317_v58  ;;  %v4264_v61 = vpop.permute.xlu1 %4263  ;;  %v931_v18 = vpop.f32.mrf.mxu1  ;;  %4463 = vmatprep.mubr.bf16.mxu0 %v5763_v11 }
 0x189   :  { %v4320_v1 = vand.u32 %v4288_v42, %v6000_v41  ;;  %v4289_v3 = vsel %vm4281_vm10, %v4262_v23, %v4264_v61  ;;  %4446 = vmatpush1.bf16.msra.mxu0 %v4314_v16  ;;  %v6969_v5 = vpop.f32.mrf.mxu0 }
 0x18a   :  { %v4323_v28 = vand.u32 %v4289_v3, %v6000_v41  ;;  %v932_v22 = vpop.f32.mrf.mxu1 }
 0x18b   :  { %v4266_v46 = vpop.permute.xlu0 %4265  ;;  %v1165_v14 = vpop.f32.mrf.mxu0  ;;  %5681 = vmatmul.mubr.msk.bf16.vlgmr.msra.gmra.mxu1 %vm171_vm3, %v6939_v21 }
 0x18c   :  { %v4290_v31 = vsel %vm4281_vm10, %v4264_v61, %v4266_v46  ;;  %v4268_v27 = vpop.permute.xlu1 %4267  ;;  %v1202_v17 = vpop.f32.mrf.mxu1  ;;  %4486 = vmatprep.subr.bf16.mxu1 %v4323_v28  ;;  %4504 = vmatprep.mubr.bf16.mxu1 %v5763_v11 }
 0x18d   :  { %v4326_v20 = vand.u32 %v4290_v31, %v6000_v41  ;;  %v4291_v51 = vsel %vm4281_vm10, %v4266_v46, %v4268_v27  ;;  %v6979_v38 = vadd.f32 %v1202_v17, %v6874_v44  ;;  %4487 = vmatpush1.bf16.msra.mxu1 %v4320_v1  ;;  %v1166_v34 = vpop.f32.mrf.mxu0 }
 0x18e   :  { %v4329_v55 = vand.u32 %v4291_v51, %v6000_v41  ;;  %v6982_v35 = vpop.f32.mrf.mxu1 }
 0x18f   :  { %v4270_v56 = vpop.permute.xlu0 %4269  ;;  %v1243_v40 = vpop.f32.mrf.mxu0  ;;  %5682 = vmatmul.mubr.msk.bf16.vlgmr.msra.gmra.mxu0 %vm171_vm3, %v6939_v21 }
 0x190   :  { %v4292_v15 = vsel %vm4281_vm10, %v4268_v27, %v4270_v56  ;;  %v6988_v62 = vadd.f32 %v1243_v40, %v6886_v32  ;;  %4527 = vmatprep.subr.bf16.mxu0 %v4329_v55  ;;  %v4272_v45 = vpop.permute.xlu1 %4271  ;;  %v1206_v44 = vpop.f32.mrf.mxu1  ;;  %4545 = vmatprep.mubr.bf16.mxu0 %v5763_v11 }
 0x191   :  { %v4332_v47 = vand.u32 %v4292_v15, %v6000_v41  ;;  %v4293_v48 = vsel %vm4281_vm10, %v4270_v56, %v4272_v45  ;;  %4528 = vmatpush1.bf16.msra.mxu0 %v4326_v20  ;;  %v6993_v52 = vpop.f32.mrf.mxu0  ;;  %v1456_v44 = vadd.f32 %v6969_v5, %v6867_v26 }
 0x192   :  { %v4335_v13 = vand.u32 %v4293_v48, %v6000_v41  ;;  %v1207_v25 = vpop.f32.mrf.mxu1  ;;  %v1460_v26 = vadd.f32 %v6993_v52, %v6893_v63 }
 0x193   :  { %v4274_v10 = vpop.permute.xlu0 %4273  ;;  %v1247_v29 = vpop.f32.mrf.mxu0  ;;  %5683 = vmatmul.mubr.msk.bf16.vlgmr.msra.gmra.mxu1 %vm171_vm3, %v6939_v21 }
 0x194   :  { %v4294_v32 = vsel %vm4281_vm10, %v4272_v45, %v4274_v10  ;;  %v4276_v7 = vpop.permute.xlu1 %4275  ;;  %v1284_v9 = vpop.f32.mrf.mxu1  ;;  %4568 = vmatprep.subr.bf16.mxu1 %v4335_v13  ;;  %4586 = vmatprep.mubr.bf16.mxu1 %v5763_v11 }
 0x195   :  { %v4338_v54 = vand.u32 %v4294_v32, %v6000_v41  ;;  %v4295_v30 = vsel %vm4281_vm10, %v4274_v10, %v4276_v7  ;;  %v7003_v19 = vadd.f32 %v1284_v9, %v6900_v60  ;;  %4569 = vmatpush1.bf16.msra.mxu1 %v4332_v47  ;;  %v1248_v16 = vpop.f32.mrf.mxu0 }
 0x196   :  { %v4341_v57 = vand.u32 %v4295_v30, %v6000_v41  ;;  %v7006_v59 = vpop.f32.mrf.mxu1 }
 0x197   :  { %v4278_v58 = vpop.permute.xlu0 %4277  ;;  %v1325_v50 = vpop.f32.mrf.mxu0  ;;  %5684 = vmatmul.mubr.msk.bf16.vlgmr.msra.gmra.mxu0 %vm171_vm3, %v6939_v21 }
 0x198   :  { %v4296_v23 = vsel %vm4281_vm10, %v4276_v7, %v4278_v58  ;;  %v7012_v12 = vadd.f32 %v1325_v50, %v6912_v24  ;;  %4609 = vmatprep.subr.bf16.mxu0 %v4341_v57  ;;  %v4280_v42 = vpop.permute.xlu1 %4279  ;;  %v1288_v60 = vpop.f32.mrf.mxu1  ;;  %4627 = vmatprep.mubr.bf16.mxu0 %v5763_v11 }
 0x199   :  { %v4344_v61 = vand.u32 %v4296_v23, %v6000_v41  ;;  %v4297_v18 = vsel %vm4281_vm10, %v4278_v58, %v4280_v42  ;;  %4610 = vmatpush1.bf16.msra.mxu0 %v4338_v54  ;;  %v1327_v1 = vpop.f32.mrf.mxu0 }
 0x19a   :  { %v4347_v3 = vand.u32 %v4297_v18, %v6000_v41  ;;  %v1289_v28 = vpop.f32.mrf.mxu1  ;;  %v1464_v42 = vadd.f32 %v1327_v1, %v6919_v36 }
 0x19b   :  { %v1329_v22 = vpop.f32.mrf.mxu0  ;;  %5685 = vmatmul.mubr.msk.bf16.vlgmr.msra.gmra.mxu1 %vm171_vm3, %v6939_v21 }
 0x19c   :  { %v1366_v24 = vpop.f32.mrf.mxu1  ;;  %4650 = vmatprep.subr.bf16.mxu1 %v4347_v3  ;;  %4668 = vmatprep.mubr.bf16.mxu1 %v5763_v11 }
 0x19d   :  { %v1465_v46 = vadd.f32 %v1366_v24, %v6926_v37  ;;  %4651 = vmatpush1.bf16.msra.mxu1 %v4344_v61  ;;  %v1330_v14 = vpop.f32.mrf.mxu0 }
 0x19e   :  { %v1368_v31 = vpop.f32.mrf.mxu1 }
 0x19f   :  { %v1466_v27 = vadd.f32 %v1368_v31, %v6931_v39  ;;  %v1407_v17 = vpop.f32.mrf.mxu0  ;;  %5686 = vmatmul.mubr.msk.bf16.vlgmr.msra.gmra.mxu0 %vm171_vm3, %v6939_v21 }
 0x1a0   :  { %v1370_v41 = vpop.f32.mrf.mxu1  ;;  %v1467_v20 = vadd.f32 %v1407_v17, %v6937_v6 }
 0x1a1   :  { %v1409_v51 = vpop.f32.mrf.mxu0 }
 0x1a2   :  { %v1371_v34 = vpop.f32.mrf.mxu1  ;;  %v1468_v55 = vadd.f32 %v1409_v51, %v6945_v53 }
 0x1a3   :  { %v1411_v56 = vpop.f32.mrf.mxu0  ;;  %5687 = vmatmul.mubr.msk.bf16.vlgmr.msra.gmra.mxu1 %vm171_vm3, %v6939_v21  ;;  %v1458_v21 = vadd.f32 %v6982_v35, %v6881_v49  ;;  %v1462_v49 = vadd.f32 %v7006_v59, %v6907_v8 }
 0x1a4   :  { %v1448_v11 = vpop.f32.mrf.mxu1 }
 0x1a5   :  { %v1469_v37 = vadd.f32 %v1448_v11, %v6954_v43  ;;  %v1412_v40 = vpop.f32.mrf.mxu0 }
 0x1a6   :  { %v1450_v39 = vpop.f32.mrf.mxu1 }
 0x1a7   :  { %v1470_v15 = vadd.f32 %v1450_v39, %v6958_v33  ;;  %v1698_v45 = vpop.f32.mrf.mxu0 }
 0x1a8   :  { %v1452_v6 = vpop.f32.mrf.mxu1  ;;  %v1992_v47 = vadd.f32 %v1698_v45, %v6964_v2 }
 0x1a9   :  { %v1700_v48 = vpop.f32.mrf.mxu0 }
 0x1aa   :  { %v1453_v53 = vpop.f32.mrf.mxu1  ;;  %v1993_v13 = vadd.f32 %v1700_v48, %v1456_v44 }
 0x1ab   :  { %v1702_v25 = vpop.f32.mrf.mxu0 }
 0x1ac   :  { %v1739_v10 = vpop.f32.mrf.mxu1 }
 0x1ad   :  { %v1994_v43 = vadd.f32 %v1739_v10, %v6979_v38  ;;  %v1703_v29 = vpop.f32.mrf.mxu0 }
 0x1ae   :  { %v1741_v32 = vpop.f32.mrf.mxu1 }
 0x1af   :  { %v1995_v33 = vadd.f32 %v1741_v32, %v1458_v21  ;;  %v1780_v7 = vpop.f32.mrf.mxu0 }
 0x1b0   :  { %v1743_v5 = vpop.f32.mrf.mxu1  ;;  %v1996_v2 = vadd.f32 %v1780_v7, %v6988_v62 }
 0x1b1   :  { %v1782_v9 = vpop.f32.mrf.mxu0 }
 0x1b2   :  { %v1744_v54 = vpop.f32.mrf.mxu1  ;;  %v1997_v30 = vadd.f32 %v1782_v9, %v1460_v26 }
 0x1b3   :  { %v1784_v16 = vpop.f32.mrf.mxu0 }
 0x1b4   :  { %v1821_v57 = vpop.f32.mrf.mxu1 }
 0x1b5   :  { %v1998_v38 = vadd.f32 %v1821_v57, %v7003_v19  ;;  %v1785_v35 = vpop.f32.mrf.mxu0 }
 0x1b6   :  { %v1823_v58 = vpop.f32.mrf.mxu1 }
 0x1b7   :  { %v1999_v50 = vadd.f32 %v1823_v58, %v1462_v49  ;;  %v1862_v23 = vpop.f32.mrf.mxu0 }
 0x1b8   :  { %v1825_v63 = vpop.f32.mrf.mxu1  ;;  %v2000_v52 = vadd.f32 %v1862_v23, %v7012_v12 }
 0x1b9   :  { %v1864_v62 = vpop.f32.mrf.mxu0 }
 0x1ba   :  { %v1826_v60 = vpop.f32.mrf.mxu1  ;;  %v7045_v61 = vadd.f32 %v1864_v62, %v1464_v42  ;;  %v7737_v42 = vmov 0.00390625  }
 0x1bb   :  { %v1866_v18 = vpop.f32.mrf.mxu0 }
 0x1bc   :  { %v1903_v3 = vpop.f32.mrf.mxu1 }
 0x1bd   :  { %v7047_v28 = vadd.f32 %v1903_v3, %v1465_v46  ;;  %v1867_v8 = vpop.f32.mrf.mxu0 }
 0x1be   :  { %v1905_v59 = vpop.f32.mrf.mxu1 }
 0x1bf   :  { %v7049_v19 = vadd.f32 %v1905_v59, %v1466_v27  ;;  %v1944_v22 = vpop.f32.mrf.mxu0 }
 0x1c0   :  { %v1907_v24 = vpop.f32.mrf.mxu1  ;;  %v7051_v14 = vadd.f32 %v1944_v22, %v1467_v20 }
 0x1c1   :  { %v1946_v36 = vpop.f32.mrf.mxu0 }
 0x1c2   :  { %v1908_v1 = vpop.f32.mrf.mxu1  ;;  %v7053_v31 = vadd.f32 %v1946_v36, %v1468_v55 }
 0x1c3   :  { %v1948_v12 = vpop.f32.mrf.mxu0 }
 0x1c4   :  { %v1985_v17 = vpop.f32.mrf.mxu1 }
 0x1c5   :  { %v7055_v41 = vadd.f32 %v1985_v17, %v1469_v37  ;;  %v1949_v51 = vpop.f32.mrf.mxu0  ;;  %v7066_v37 = vand.u32 127, %v49_v0 }
 0x1c6   :  { %v1987_v34 = vpop.f32.mrf.mxu1 }
 0x1c7   :  { %v7057_v46 = vadd.f32 %v1987_v34, %v1470_v15  ;;  %v2235_v56 = vpop.f32.mrf.mxu0  ;;  %v4735_v0 = vadd.s32 384, %v7066_v37 }
 0x1c8   :  { %v1989_v11 = vpop.f32.mrf.mxu1  ;;  %v7059_v27 = vadd.f32 %v2235_v56, %v1992_v47  ;;  %v4733_v47 = vadd.s32 128, %v7066_v37 }
 0x1c9   :  { %v2237_v40 = vpop.f32.mrf.mxu0  ;;  %v4753_v58 = vshra.s32 %v4735_v0, 10  ;;  %v4801_v63 = vand.u32 31, %v4735_v0 }
 0x1ca   :  { %v1990_v39 = vpop.f32.mrf.mxu1  ;;  %v7061_v20 = vadd.f32 %v2237_v40, %v1993_v13  ;;  %v4767_v32 = vshra.s32 %v4733_v47, 5  ;;  %v4751_v26 = vshra.s32 %v4733_v47, 10  ;;  %v4799_v54 = vand.u32 31, %v4733_v47 }
 0x1cb   :  { %v2239_v45 = vpop.f32.mrf.mxu0  ;;  %vm4817_vm0 = vcmp.eq.s32.totalorder %v4753_v58, %v5828_v4  ;;  %vm4865_vm2 = vcmp.lt.s32.totalorder %v4801_v63, 16 }
 0x1cc   :  { %v2276_v44 = vpop.f32.mrf.mxu1  ;;  %v4783_v5 = vand.u32 31, %v4767_v32  ;;  %vm4815_vm11 = vcmp.eq.s32.totalorder %v4751_v26, %v5828_v4  ;;  %vm4863_vm14 = vcmp.lt.s32.totalorder %v4799_v54, 16 }
 0x1cd   :  { %v7063_v55 = vadd.f32 %v2276_v44, %v1994_v43  ;;  %v2240_v6 = vpop.f32.mrf.mxu0 }
 0x1ce   :  { %v2278_v48 = vpop.f32.mrf.mxu1  ;;  %vm4831_vm12 = vcmp.lt.s32.totalorder %v4783_v5, 16 }
 0x1cf   :  { %v7068_v53 = vadd.f32 %v2278_v48, %v1995_v33  ;;  %v2317_v15 = vpop.f32.mrf.mxu0  ;;  %vm4847_vm13 = vmand %vm4815_vm11, %vm4831_vm12 }
 0x1d0   :  { %v2280_v25 = vpop.f32.mrf.mxu1  ;;  %v7070_v10 = vadd.f32 %v2317_v15, %v1996_v2  ;;  %v4769_v2 = vshra.s32 %v4735_v0, 5  ;;  %vm4879_vm15 = vmand %vm4847_vm13, %vm4863_vm14 }
 0x1d1   :  { %v2319_v21 = vpop.f32.mrf.mxu0  ;;  %5688 = vmatprep.mubr.msk.f32.mxu0 %vm4879_vm15, %v7737_v42 }
 0x1d2   :  { %v2281_v13 = vpop.f32.mrf.mxu1  ;;  %v7073_v29 = vadd.f32 %v2319_v21, %v1997_v30 }
 0x1d3   :  { %v2321_v43 = vpop.f32.mrf.mxu0 }
 0x1d4   :  { %v2358_v7 = vpop.f32.mrf.mxu1 }
 0x1d5   :  { %v7076_v9 = vadd.f32 %v2358_v7, %v1998_v38  ;;  %v2322_v33 = vpop.f32.mrf.mxu0  ;;  %v4785_v38 = vand.u32 31, %v4769_v2 }
 0x1d6   :  { %v2360_v16 = vpop.f32.mrf.mxu1 }
 0x1d7   :  { %v2536_v57 = vadd.f32 %v2360_v16, %v1999_v50  ;;  %v2399_v49 = vpop.f32.mrf.mxu0  ;;  %vm4833_vm1 = vcmp.lt.s32.totalorder %v4785_v38, 16 }
 0x1d8   :  { %v2362_v30 = vpop.f32.mrf.mxu1  ;;  %v2537_v35 = vadd.f32 %v2399_v49, %v2000_v52  ;;  %vm4849_vm3 = vmand %vm4817_vm0, %vm4833_vm1 }
 0x1d9   :  { %v2401_v23 = vpop.f32.mrf.mxu0  ;;  %vm4881_vm4 = vmand %vm4849_vm3, %vm4865_vm2 }
 0x1da   :  { %v2363_v62 = vpop.f32.mrf.mxu1  ;;  %v2538_v60 = vadd.f32 %v2401_v23, %v7045_v61  ;;  %5690 = vmatprep.mubr.msk.f32.mxu1 %vm4881_vm4, %v7737_v42  ;;  %v7211_v42 = vadd.s32 768, %v7066_v37 }
 0x1db   :  { %v2403_v18 = vpop.f32.mrf.mxu0 }
 0x1dc   :  { %v2440_v50 = vpop.f32.mrf.mxu1 }
 0x1dd   :  { %v2539_v52 = vadd.f32 %v2440_v50, %v7047_v28  ;;  %v2404_v3 = vpop.f32.mrf.mxu0 }
 0x1de   :  { %v2442_v8 = vpop.f32.mrf.mxu1 }
 0x1df   :  { %v2540_v59 = vadd.f32 %v2442_v8, %v7049_v19  ;;  %v2481_v22 = vpop.f32.mrf.mxu0 }
 0x1e0   :  { %v2444_v24 = vpop.f32.mrf.mxu1  ;;  %v2541_v61 = vadd.f32 %v2481_v22, %v7051_v14 }
 0x1e1   :  { %v2483_v36 = vpop.f32.mrf.mxu0 }
 0x1e2   :  { %v2445_v1 = vpop.f32.mrf.mxu1  ;;  %v2542_v12 = vadd.f32 %v2483_v36, %v7053_v31 }
 0x1e3   :  { %v2485_v17 = vpop.f32.mrf.mxu0 }
 0x1e4   :  { %v2522_v51 = vpop.f32.mrf.mxu1 }
 0x1e5   :  { %v2543_v34 = vadd.f32 %v2522_v51, %v7055_v41  ;;  %v2486_v28 = vpop.f32.mrf.mxu0 }
 0x1e6   :  { %v2524_v56 = vpop.f32.mrf.mxu1 }
 0x1e7   :  { %v2544_v11 = vadd.f32 %v2524_v56, %v7057_v46  ;;  %v2772_v40 = vpop.f32.mrf.mxu0 }
 0x1e8   :  { %v2526_v39 = vpop.f32.mrf.mxu1  ;;  %v7090_v19 = vadd.f32 %v2772_v40, %v7059_v27 }
 0x1e9   :  { %v2774_v45 = vpop.f32.mrf.mxu0 }
 0x1ea   :  { %v2527_v44 = vpop.f32.mrf.mxu1  ;;  %v7093_v14 = vadd.f32 %v2774_v45, %v7061_v20 }
 0x1eb   :  { %v2776_v6 = vpop.f32.mrf.mxu0 }
 0x1ec   :  { %v2813_v31 = vpop.f32.mrf.mxu1 }
 0x1ed   :  { %v7096_v48 = vadd.f32 %v2813_v31, %v7063_v55  ;;  %v2777_v41 = vpop.f32.mrf.mxu0 }
 0x1ee   :  { %v2815_v15 = vpop.f32.mrf.mxu1 }
 0x1ef   :  { %v7099_v25 = vadd.f32 %v2815_v15, %v7068_v53  ;;  %v2854_v46 = vpop.f32.mrf.mxu0 }
 0x1f0   :  { %v2817_v47 = vpop.f32.mrf.mxu1  ;;  %v7102_v27 = vadd.f32 %v2854_v46, %v7070_v10 }
 0x1f1   :  { %v2856_v21 = vpop.f32.mrf.mxu0 }
 0x1f2   :  { %v2818_v13 = vpop.f32.mrf.mxu1  ;;  %v7105_v20 = vadd.f32 %v2856_v21, %v7073_v29 }
 0x1f3   :  { %v2858_v32 = vpop.f32.mrf.mxu0 }
 0x1f4   :  { %v2895_v43 = vpop.f32.mrf.mxu1 }
 0x1f5   :  { %v7108_v55 = vadd.f32 %v2895_v43, %v7076_v9  ;;  %v2859_v7 = vpop.f32.mrf.mxu0 }
 0x1f6   :  { %v2897_v26 = vpop.f32.mrf.mxu1 }
 0x1f7   :  { %v7110_v5 = vadd.f32 %v2897_v26, %v2536_v57  ;;  %v2936_v53 = vpop.f32.mrf.mxu0 }
 0x1f8   :  { %v2899_v0 = vpop.f32.mrf.mxu1  ;;  %v7112_v33 = vadd.f32 %v2936_v53, %v2537_v35 }
 0x1f9   :  { %v2938_v10 = vpop.f32.mrf.mxu0 }
 0x1fa   :  { %v2900_v54 = vpop.f32.mrf.mxu1  ;;  %v7114_v16 = vadd.f32 %v2938_v10, %v2538_v60 }
 0x1fb   :  { %v2940_v2 = vpop.f32.mrf.mxu0 }
 0x1fc   :  { %v2977_v29 = vpop.f32.mrf.mxu1 }
 0x1fd   :  { %v7116_v49 = vadd.f32 %v2977_v29, %v2539_v52  ;;  %v2941_v30 = vpop.f32.mrf.mxu0 }
 0x1fe   :  { %v2979_v58 = vpop.f32.mrf.mxu1 }
 0x1ff   :  { %v7118_v9 = vadd.f32 %v2979_v58, %v2540_v59  ;;  %v3018_v23 = vpop.f32.mrf.mxu0 }
 0x200   :  { %v2981_v38 = vpop.f32.mrf.mxu1  ;;  %v7120_v57 = vadd.f32 %v3018_v23, %v2541_v61 }
 0x201   :  { %7741 = vst [vmem:[#allocation3_spill] sm:$0xff] %v7118_v9  ;;  %v3020_v63 = vpop.f32.mrf.mxu0 }
 0x202   :  { %7742 = vst [vmem:[#allocation4_spill] sm:$0xff] %v7120_v57  ;;  %v2982_v62 = vpop.f32.mrf.mxu1  ;;  %v7122_v35 = vadd.f32 %v3020_v63, %v2542_v12 }
 0x203   :  { %v3022_v18 = vpop.f32.mrf.mxu0 }
 0x204   :  { %7743 = vst [vmem:[#allocation5_spill] sm:$0xff] %v7122_v35  ;;  %v3059_v50 = vpop.f32.mrf.mxu1 }
 0x205   :  { %v7124_v60 = vadd.f32 %v3059_v50, %v2543_v34  ;;  %v3023_v3 = vpop.f32.mrf.mxu0 }
 0x206   :  { %v3061_v8 = vpop.f32.mrf.mxu1 }
 0x207   :  { %7744 = vst [vmem:[#allocation6_spill] sm:$0xff] %v7124_v60  ;;  %v7126_v52 = vadd.f32 %v3061_v8, %v2544_v11  ;;  %v7128_v22 = vpop.f32.mrf.mxu0 }
 0x208   :  { %v3063_v59 = vpop.f32.mrf.mxu1 }
 0x209   :  { %7745 = vst [vmem:[#allocation7_spill] sm:$0xff] %v7126_v52  ;;  %v7130_v24 = vpop.f32.mrf.mxu0 }
 0x20a   :  { %v3064_v36 = vpop.f32.mrf.mxu1 }
 0x20b   :  { %v3313_v61 = vpop.f32.mrf.mxu0 }
 0x20c   :  { %v7132_v1 = vpop.f32.mrf.mxu1 }
 0x20d   :  { %v3314_v17 = vpop.f32.mrf.mxu0 }
 0x20e   :  { %v7134_v12 = vpop.f32.mrf.mxu1 }
 0x20f   :  { %v7136_v51 = vpop.f32.mrf.mxu0 }
 0x210   :  { %v3354_v34 = vpop.f32.mrf.mxu1 }
 0x211   :  { %v7138_v28 = vpop.f32.mrf.mxu0 }
 0x212   :  { %v3355_v56 = vpop.f32.mrf.mxu1 }
 0x213   :  { %v3395_v11 = vpop.f32.mrf.mxu0 }
 0x214   :  { %v7140_v40 = vpop.f32.mrf.mxu1  ;;  %v4737_v11 = vadd.s32 640, %v7066_v37 }
 0x215   :  { %v3396_v39 = vpop.f32.mrf.mxu0 }
 0x216   :  { %v7142_v45 = vpop.f32.mrf.mxu1 }
 0x217   :  { %v7144_v44 = vpop.f32.mrf.mxu0 }
 0x218   :  { %v3436_v6 = vpop.f32.mrf.mxu1 }
 0x219   :  { %v7146_v31 = vpop.f32.mrf.mxu0  ;;  %v7182_v6 = vadd.s32 256, %v7066_v37 }
 0x21a   :  { %v3437_v41 = vpop.f32.mrf.mxu1 }
 0x21b   :  { %v3477_v15 = vpop.f32.mrf.mxu0 }
 0x21c   :  { %v7148_v46 = vpop.f32.mrf.mxu1  ;;  %v4766_v15 = vshra.s32 %v7066_v37, 5 }
 0x21d   :  { %7746 = vst [vmem:[#allocation8_spill] sm:$0xff] %v7148_v46  ;;  %v3478_v47 = vpop.f32.mrf.mxu0 }
 0x21e   :  { %v7150_v21 = vpop.f32.mrf.mxu1 }
 0x21f   :  { %7747 = vst [vmem:[#allocation9_spill] sm:$0xff] %v7150_v21  ;;  %v7152_v13 = vpop.f32.mrf.mxu0 }
 0x220   :  { %7748 = vst [vmem:[#allocation10_spill] sm:$0xff] %v7152_v13  ;;  %v3518_v32 = vpop.f32.mrf.mxu1 }
 0x221   :  { %v7154_v43 = vpop.f32.mrf.mxu0  ;;  %v7188_v32 = vadd.s32 512, %v7066_v37 }
 0x222   :  { %7749 = vst [vmem:[#allocation11_spill] sm:$0xff] %v7154_v43  ;;  %v3519_v7 = vpop.f32.mrf.mxu1  ;;  %v7788_v43 = vmov 0 }
 0x223   :  { %v3559_v26 = vpop.f32.mrf.mxu0 }
 0x224   :  { %v7156_v53 = vpop.f32.mrf.mxu1  ;;  %v4771_v26 = vshra.s32 %v4737_v11, 5 }
 0x225   :  { %7750 = vst [vmem:[#allocation12_spill] sm:$0xff] %v7156_v53  ;;  %v3560_v0 = vpop.f32.mrf.mxu0 }
 0x226   :  { %v7158_v10 = vpop.f32.mrf.mxu1 }
 0x227   :  { %7751 = vst [vmem:[#allocation13_spill] sm:$0xff] %v7158_v10  ;;  %v7160_v54 = vpop.f32.mrf.mxu0 }
 0x228   :  { %v3600_v2 = vpop.f32.mrf.mxu1 }
 0x229   :  { %v7162_v29 = vpop.f32.mrf.mxu0  ;;  %v4750_v2 = vshra.s32 %v7066_v37, 10 }
 0x22a   :  { %v3601_v30 = vpop.f32.mrf.mxu1 }
 0x22b   :  { %v3850_v58 = vpop.f32.mrf.mxu0  ;;  %v4768_v30 = vshra.s32 %v7182_v6, 5  ;;  %vm7214_vm5 = vcmp.eq.s32.totalorder %v4750_v2, %v5828_v4 }
 0x22c   :  { %v7164_v23 = vpop.f32.mrf.mxu1  ;;  %v7195_v58 = vadd.s32 896, %v7066_v37 }
 0x22d   :  { %v3851_v38 = vpop.f32.mrf.mxu0  ;;  %v7219_v52 = vand.u32 31, %v4768_v30 }
 0x22e   :  { %v7166_v63 = vpop.f32.mrf.mxu1  ;;  %v4773_v53 = vshra.s32 %v7195_v58, 5 }
 0x22f   :  { %v7168_v62 = vpop.f32.mrf.mxu0 }
 0x230   :  { %v3891_v18 = vpop.f32.mrf.mxu1  ;;  %v7262_v13 = vand.u32 31, %v4773_v53 }
 0x231   :  { %v7170_v50 = vpop.f32.mrf.mxu0  ;;  %v7199_v18 = vand.u32 31, %v4766_v15  ;;  %v7782_v15 = vmov 0 }
 0x232   :  { %v3892_v3 = vpop.f32.mrf.mxu1 }
 0x233   :  { %v3932_v8 = vpop.f32.mrf.mxu0  ;;  %vm4830_vm6 = vcmp.lt.s32.totalorder %v7199_v18, 16 }
 0x234   :  { %v7172_v59 = vpop.f32.mrf.mxu1  ;;  %v4755_v8 = vshra.s32 %v4737_v11, 10  ;;  %vm7328_vm0 = vmand %vm7214_vm5, %vm4830_vm6  ;;  %vm7790_vm6 = vcmp.lt.s32.totalorder %v7219_v52, 16 }
 0x235   :  { %v3933_v36 = vpop.f32.mrf.mxu0 }
 0x236   :  { %v7174_v61 = vpop.f32.mrf.mxu1  ;;  %v4770_v36 = vshra.s32 %v7188_v32, 5  ;;  %vm7230_vm7 = vcmp.eq.s32.totalorder %v4755_v8, %v5828_v4  ;;  %v7248_v8 = vadd.s32 1408, %v7066_v37 }
 0x237   :  { %v7176_v17 = vpop.f32.mrf.mxu0 }
 0x238   :  { %v3973_v34 = vpop.f32.mrf.mxu1  ;;  %v7234_v30 = vand.u32 31, %v4770_v36  ;;  %v3604_v36 = vadd.f32 %v7130_v24, %v7093_v14  ;;  %v4805_v14 = vand.u32 31, %v7195_v58  ;;  %v4756_v24 = vshra.s32 %v7211_v42, 10 }
 0x239   :  { %v7178_v56 = vpop.f32.mrf.mxu0  ;;  %v7203_v34 = vadd.s32 1152, %v7066_v37 }
 0x23a   :  { %v3974_v39 = vpop.f32.mrf.mxu1  ;;  %vm7305_vm2 = vcmp.lt.s32.totalorder %v4805_v14, 16  ;;  %vm7344_vm5 = vcmp.eq.s32.totalorder %v4756_v24, %v5828_v4  ;;  %v7366_v24 = vadd.s32 1536, %v7066_v37 }
 0x23b   :  { %v4014_v41 = vpop.f32.mrf.mxu0  ;;  %v4775_v35 = vshra.s32 %v7203_v34, 5  ;;  %v7783_v15 = vsel %vm7344_vm5, 4294967295, %v7782_v15 }
 0x23c   :  { %v7185_v47 = vpop.f32.mrf.mxu1  ;;  %v4798_v41 = vand.u32 31, %v7066_v37 }
 0x23d   :  { %7752 = vst [vmem:[#allocation14_spill] sm:$0xff] %v7185_v47  ;;  %v4015_v7 = vpop.f32.mrf.mxu0  ;;  %v7466_v47 = vadd.s32 1920, %v7066_v37 }
 0x23e   :  { %v7190_v0 = vpop.f32.mrf.mxu1  ;;  %v7208_v7 = vand.u32 31, %v4771_v26  ;;  %v4800_v26 = vand.u32 31, %v7182_v6  ;;  %vm7238_vm8 = vcmp.lt.s32.totalorder %v4798_v41, 16 }
 0x23f   :  { %7753 = vst [vmem:[#allocation15_spill] sm:$0xff] %v7190_v0  ;;  %v7197_v38 = vpop.f32.mrf.mxu0  ;;  %v4802_v0 = vand.u32 31, %v7188_v32 }
 0x240   :  { %7754 = vst [vmem:[#allocation16_spill] sm:$0xff] %v7197_v38  ;;  %v4055_v3 = vpop.f32.mrf.mxu1  ;;  %v4754_v38 = vshra.s32 %v7188_v32, 10  ;;  %vm4835_vm9 = vcmp.lt.s32.totalorder %v7208_v7, 16  ;;  %v7273_v32 = vpop.permute.xlu0 %4696  ;;  %vm7284_vm14 = vcmp.lt.s32.totalorder %v4800_v26, 16  ;;  %v3606_v26 = vadd.f32 %v7134_v12, %v7099_v25 }
 0x241   :  { %v7205_v39 = vpop.f32.mrf.mxu0  ;;  %v4752_v3 = vshra.s32 %v7182_v6, 10  ;;  %v4761_v12 = vshra.s32 %v7248_v8, 10  ;;  %vm7332_vm1 = vcmp.lt.s32.totalorder %v4802_v0, 16  ;;  %v7350_v0 = vadd.s32 1664, %v7066_v37  ;;  %vm7356_vm4 = vmand %vm7230_vm7, %vm4835_vm9 }
 0x242   :  { %7755 = vst [vmem:[#allocation17_spill] sm:$0xff] %v7205_v39  ;;  %v4056_v10 = vpop.f32.mrf.mxu1  ;;  %v4803_v39 = vand.u32 31, %v4737_v11  ;;  %vm7293_vm15 = vcmp.eq.s32.totalorder %v4754_v38, %v5828_v4 }
 0x243   :  { %v4096_v60 = vpop.f32.mrf.mxu0  ;;  %v3603_v10 = vadd.f32 %v7128_v22, %v7090_v19  ;;  %v4772_v19 = vshra.s32 %v7211_v42, 5  ;;  %v7245_v22 = vadd.s32 1024, %v7066_v37  ;;  %vm7256_vm10 = vcmp.eq.s32.totalorder %v4752_v3, %v5828_v4 }
 0x244   :  { %v7227_v2 = vpop.f32.mrf.mxu1  ;;  %v4757_v60 = vshra.s32 %v7195_v58, 10  ;;  %vm7264_vm12 = vcmp.lt.s32.totalorder %v4803_v39, 16  ;;  %v4759_v3 = vshra.s32 %v7203_v34, 10  ;;  %v7280_v39 = vand.u32 31, %v4775_v35  ;;  %v7831_v38 = vld [vmem:[#allocation14_spill] sm:$0xff] }
 0x245   :  { %7758 = vst [vmem:[#allocation18_spill] sm:$0xff] %v7227_v2  ;;  %v4097_v6 = vpop.f32.mrf.mxu0  ;;  %v4140_v2 = vadd.f32 %v7160_v54, %v3603_v10  ;;  %v4141_v10 = vadd.f32 %v7162_v29, %v3604_v36  ;;  %v3605_v58 = vadd.f32 %v7132_v1, %v7096_v48  ;;  %v7288_v29 = vand.u32 31, %v4772_v19 }
 0x246   :  { %v7253_v6 = vpop.f32.mrf.mxu1  ;;  %vm7276_vm13 = vcmp.eq.s32.totalorder %v4757_v60, %v5828_v4  ;;  %v4807_v48 = vand.u32 31, %v7203_v34  ;;  %v4758_v1 = vshra.s32 %v7245_v22, 10  ;;  %vm7314_vm3 = vcmp.eq.s32.totalorder %v4759_v3, %v5828_v4 }
 0x247   :  { %7763 = vst [vmem:[#allocation19_spill] sm:$0xff] %v7253_v6  ;;  %v4383_v57 = vpop.f32.mrf.mxu0  ;;  %v4142_v19 = vadd.f32 %v7164_v23, %v3605_v58  ;;  %v4143_v23 = vadd.f32 %v7166_v63, %v3606_v26  ;;  %vm7375_vm9 = vcmp.eq.s32.totalorder %v4761_v12, %v5828_v4  ;;  %v7793_v12 = vand.u32 31, %v7211_v42 }
 0x248   :  { %v4137_v6 = vpop.f32.mrf.mxu1  ;;  %v4677_v21 = vadd.f32 %v4383_v57, %v4140_v2  ;;  %v4774_v57 = vshra.s32 %v7245_v22, 5  ;;  %v4777_v2 = vshra.s32 %v7248_v8, 5  ;;  %vm7360_vm11 = vcmp.lt.s32.totalorder %v4807_v48, 16 }
 0x249   :  { %v4385_v9 = vpop.f32.mrf.mxu0  ;;  %v7789_v43 = vsel %vm7375_vm9, 4294967295, %v7788_v43  ;;  %vm7393_vm7 = vcmp.lt.s32.totalorder %v7793_v12, 16  ;;  %v4763_v41 = vshra.s32 %v7350_v0, 10  ;;  %vm7798_vm9 = vcmp.lt.s32.totalorder %v7262_v13, 16 }
 0x24a   :  { %v4138_v60 = vpop.f32.mrf.mxu1  ;;  %v4678_v36 = vadd.f32 %v4385_v9, %v4141_v10  ;;  %v4699_v9 = vadd.f32 %v7273_v32, %v4677_v21  ;;  %v4806_v10 = vand.u32 31, %v7245_v22  ;;  %v7321_v21 = vadd.s32 1280, %v7066_v37  ;;  %vm7420_vm5 = vmand %vm7276_vm13, %vm7798_vm9 }
 0x24b   :  { %v4387_v6 = vpop.f32.mrf.mxu0  ;;  %v3607_v60 = vadd.f32 %v7136_v51, %v7102_v27  ;;  %v7336_v3 = vand.u32 31, %v4774_v57  ;;  %vm7804_vm13 = vmand %vm7328_vm0, %vm7238_vm8  ;;  %vm7806_vm8 = vcmp.lt.s32.totalorder %v7234_v30, 16  ;;  %v4811_v27 = vand.u32 31, %v7350_v0 }
 0x24c   :  { %v4700_v34 = vadd.f32 %v7273_v32, %v4678_v36  ;;  %v4424_v46 = vpop.f32.mrf.mxu1  ;;  %v7338_v36 = vand.u32 31, %v4777_v2  ;;  %v4808_v42 = vand.u32 31, %v7321_v21  ;;  %vm7454_vm0 = vmand %vm7293_vm15, %vm7806_vm8  ;;  %v3612_v30 = vadd.f32 %v7146_v31, %v7114_v16 }
 0x24d   :  { %v4679_v14 = vadd.f32 %v4424_v46, %v4142_v19  ;;  %v4388_v58 = vpop.f32.mrf.mxu0  ;;  %v3608_v46 = vadd.f32 %v7138_v28, %v7105_v20  ;;  %v4144_v63 = vadd.f32 %v7168_v62, %v3607_v60  ;;  %v4715_v19 = vmax.f32 %v4699_v9, 0.0 }
 0x24e   :  { %v4716_v18 = vmax.f32 %v4700_v34, 0.0  ;;  %v4426_v26 = vpop.f32.mrf.mxu1  ;;  %v7786_v28 = vmov 0  ;;  %v4809_v62 = vand.u32 31, %v7248_v8  ;;  %v4776_v8 = vshra.s32 %v7321_v21, 5 }
 0x24f   :  { %v4680_v57 = vadd.f32 %v4426_v26, %v4143_v23  ;;  %v4465_v2 = vpop.f32.mrf.mxu0  ;;  %v7787_v28 = vsel %vm7360_vm11, 4294967295, %v7786_v28  ;;  %v4145_v6 = vadd.f32 %v7170_v50, %v3608_v46  ;;  %v4701_v9 = vadd.f32 %v7273_v32, %v4679_v14  ;;  %vm7387_vm11 = vmand %vm7256_vm10, %vm7790_vm6 }
 0x250   :  { %v4428_v7 = vpop.f32.mrf.mxu1  ;;  %v4681_v60 = vadd.f32 %v4465_v2, %v4144_v63  ;;  %4940 = vmatprep.subr.mxu0 %v4716_v18  ;;  %v3609_v50 = vadd.f32 %v7140_v40, %v7108_v55  ;;  %v4760_v55 = vshra.s32 %v7321_v21, 10  ;;  %vm7404_vm6 = vcmp.eq.s32.totalorder %v4758_v1, %v5828_v4  ;;  %vm4880_vm9 = vmand %vm7387_vm11, %vm7284_vm14 }
 0x251   :  { %v4702_v48 = vadd.f32 %v7273_v32, %v4680_v57  ;;  %v4467_v34 = vpop.f32.mrf.mxu0  ;;  %4941 = vmatpush1.xpose.msra.mxu0 %v4715_v19  ;;  %v4779_v46 = vshra.s32 %v7350_v0, 5  ;;  %v3610_v63 = vadd.f32 %v7142_v45, %v7110_v5  ;;  %vm7424_vm10 = vcmp.lt.s32.totalorder %v4809_v62, 16  ;;  %vm7825_vm11 = vmand %vm7420_vm5, %vm7305_vm2 }
 0x252   :  { %v4429_v40 = vpop.f32.mrf.mxu1  ;;  %v4682_v58 = vadd.f32 %v4467_v34, %v4145_v6  ;;  %v4146_v18 = vadd.f32 %v7172_v59, %v3609_v50  ;;  %v4703_v57 = vadd.f32 %v7273_v32, %v4681_v60  ;;  %v7801_v21 = vmov 0 }
 0x253   :  { %v4718_v26 = vmax.f32 %v4702_v48, 0.0  ;;  %v4469_v1 = vpop.f32.mrf.mxu0  ;;  %v7802_v21 = vsel %vm7424_vm10, 4294967295, %v7801_v21  ;;  %v3611_v5 = vadd.f32 %v7144_v44, %v7112_v33  ;;  %v4717_v45 = vmax.f32 %v4701_v9, 0.0  ;;  %vm7805_vm10 = vmand %vm7356_vm4, %vm7264_vm12  ;;  %v7829_v40 = vld [vmem:[#allocation3_spill] sm:$0xff] }
 0x254   :  { %v4704_v59 = vadd.f32 %v7273_v32, %v4682_v58  ;;  %v4506_v19 = vpop.f32.mrf.mxu1  ;;  %v7803_v6 = vmov 0.00390625   ;;  %v7441_v13 = vand.u32 31, %v4776_v8  ;;  %v4147_v33 = vadd.f32 %v7174_v61, %v3610_v63  ;;  %v7818_v8 = vld [vmem:[#allocation8_spill] sm:$0xff]  ;;  %v7830_v58 = vld [vmem:[#allocation9_spill] sm:$0xff]  ;;  %v7837_v1 = vld [vmem:[#allocation10_spill] sm:$0xff] }
 0x255   :  { %5689 = vmatmul.mubr.msk.f32.vlgmr.msra.gmra.mxu0 %vm7804_vm13, %v7803_v6  ;;  %v4683_v44 = vadd.f32 %v4506_v19, %v4146_v18  ;;  %5010 = vmatprep.subr.mxu1 %v4718_v26  ;;  %v4470_v53 = vpop.f32.mrf.mxu0  ;;  %vm7460_vm13 = vcmp.lt.s32.totalorder %v4806_v10, 16  ;;  %v4148_v35 = vadd.f32 %v7176_v17, %v3611_v5  ;;  %v4795_v22 = vand.u32 31, %v4779_v46  ;;  %v7851_v17 = vld [vmem:[#allocation6_spill] sm:$0xff] }
 0x256   :  { %5692 = vmatprep.mubr.msk.f32.mxu0 %vm7805_vm10, %v7803_v6  ;;  %v4720_v20 = vmax.f32 %v4704_v59, 0.0  ;;  %v4508_v62 = vpop.f32.mrf.mxu1  ;;  %5011 = vmatpush1.xpose.msra.mxu1 %v4717_v45  ;;  %v4719_v10 = vmax.f32 %v4703_v57, 0.0  ;;  %vm7811_vm15 = vcmp.lt.s32.totalorder %v7280_v39, 16  ;;  %vm7484_vm10 = vcmp.eq.s32.totalorder %v4760_v55, %v5828_v4  ;;  %v7836_v57 = vld [vmem:[#allocation4_spill] sm:$0xff] }
 0x257   :  { %v4684_v9 = vadd.f32 %v4508_v62, %v4147_v33  ;;  %v4547_v0 = vpop.f32.mrf.mxu0  ;;  %vm7479_vm4 = vmand %vm7314_vm3, %vm7811_vm15  ;;  %v7814_v31 = vmov 0  ;;  %vm7489_vm8 = vcmp.eq.s32.totalorder %v4763_v41, %v5828_v4  ;;  %v4149_v7 = vadd.f32 %v7178_v56, %v3612_v30  ;;  %v7844_v30 = vld [vmem:[#allocation11_spill] sm:$0xff] }
 0x258   :  { %v7815_v31 = vsel %vm7484_vm10, 4294967295, %v7814_v31  ;;  %v4705_v39 = vadd.f32 %v7273_v32, %v4683_v44  ;;  %v4510_v60 = vpop.f32.mrf.mxu1  ;;  %v4685_v25 = vadd.f32 %v4547_v0, %v4148_v35  ;;  %5080 = vmatprep.subr.mxu0 %v4720_v20  ;;  %v3613_v50 = vadd.f32 %v7818_v8, %v7116_v49  ;;  %v7845_v20 = vld [vmem:[#allocation16_spill] sm:$0xff] }
 0x259   :  { %v4706_v48 = vadd.f32 %v7273_v32, %v4684_v9  ;;  %v4549_v34 = vpop.f32.mrf.mxu0  ;;  %5081 = vmatpush1.xpose.msra.mxu0 %v4719_v10  ;;  %5691 = vmatmul.mubr.msk.f32.vlgmr.msra.gmra.mxu1 %vm4880_vm9, %v7803_v6  ;;  %vm7819_vm12 = vcmp.lt.s32.totalorder %v7288_v29, 16  ;;  %vm7820_vm3 = vnez %v7783_v15  ;;  %vm7517_vm15 = vcmp.lt.s32.totalorder %v4811_v27, 16  ;;  %v7843_v27 = vld [vmem:[#allocation5_spill] sm:$0xff] }
 0x25a   :  { %vm7513_vm10 = vmand %vm7820_vm3, %vm7819_vm12  ;;  %v4781_v12 = vshra.s32 %v7466_v47, 5  ;;  %v4511_v55 = vpop.f32.mrf.mxu1  ;;  %v4686_v23 = vadd.f32 %v4549_v34, %v4149_v7  ;;  %5694 = vmatprep.mubr.msk.f32.mxu1 %vm7825_vm11, %v7803_v6  ;;  %vm7826_vm14 = vnez %v7787_v28  ;;  %vm7532_vm12 = vcmp.lt.s32.totalorder %v4808_v42, 16  ;;  %v7850_v60 = vld [vmem:[#allocation17_spill] sm:$0xff]  ;;  %v7852_v34 = vld [vmem:[#allocation12_spill] sm:$0xff] }
 0x25b   :  { %vm4887_vm9 = vmand %vm7479_vm4, %vm7826_vm14  ;;  %v4762_v29 = vshra.s32 %v7366_v24, 10  ;;  %v4778_v15 = vshra.s32 %v7366_v24, 5  ;;  %v3614_v41 = vadd.f32 %v7830_v58, %v7829_v40  ;;  %v4150_v46 = vadd.f32 %v7831_v38, %v3613_v50  ;;  %v4551_v26 = vpop.f32.mrf.mxu0  ;;  %v7862_v40 = vld [vmem:[#allocation13_spill] sm:$0xff] }
 0x25c   :  { %v4722_v63 = vmax.f32 %v4706_v48, 0.0  ;;  %v4707_v18 = vadd.f32 %v7273_v32, %v4685_v25  ;;  %vm7832_vm2 = vcmp.lt.s32.totalorder %v7338_v36, 16  ;;  %vm7833_vm5 = vnez %v7789_v43  ;;  %v4588_v59 = vpop.f32.mrf.mxu1  ;;  %vm7838_vm3 = vmand %vm7454_vm0, %vm7332_vm1  ;;  %v7839_v43 = vld [vmem:[#allocation15_spill] sm:$0xff] }
 0x25d   :  { %vm7546_vm11 = vmand %vm7833_vm5, %vm7832_vm2  ;;  %v3615_v2 = vadd.f32 %v7837_v1, %v7836_v57  ;;  %v4721_v5 = vmax.f32 %v4705_v39, 0.0  ;;  %v4708_v45 = vadd.f32 %v7273_v32, %v4686_v23  ;;  %5693 = vmatmul.mubr.msk.f32.vlgmr.msra.gmra.mxu0 %vm7838_vm3, %v7803_v6  ;;  %v7564_v36 = vadd.s32 1792, %v7066_v37  ;;  %v4552_v44 = vpop.f32.mrf.mxu0 }
 0x25e   :  { %vm4884_vm2 = vmand %vm7513_vm10, %vm7393_vm7  ;;  %v4151_v19 = vadd.f32 %v7839_v43, %v3614_v41  ;;  %v4687_v33 = vadd.f32 %v4588_v59, %v4150_v46  ;;  %5150 = vmatprep.subr.mxu1 %v4722_v63  ;;  %5696 = vmatprep.mubr.msk.f32.mxu0 %vm4887_vm9, %v7803_v6  ;;  %vm7840_vm1 = vcmp.lt.s32.totalorder %v7336_v3, 16  ;;  %v4765_v53 = vshra.s32 %v7466_v47, 10  ;;  %v4590_v28 = vpop.f32.mrf.mxu1  ;;  %v7863_v41 = vld [vmem:[#allocation18_spill] sm:$0xff] }
 0x25f   :  { %vm7577_vm0 = vmand %vm7404_vm6, %vm7840_vm1  ;;  %v4797_v11 = vand.u32 31, %v4781_v12  ;;  %v3616_v35 = vadd.f32 %v7844_v30, %v7843_v27  ;;  %v4152_v62 = vadd.f32 %v7845_v20, %v3615_v2  ;;  %v4724_v10 = vmax.f32 %v4708_v45, 0.0  ;;  %5151 = vmatpush1.xpose.msra.mxu1 %v4721_v5  ;;  %v4629_v0 = vpop.f32.mrf.mxu0  ;;  %v7869_v2 = vld [vmem:[#allocation19_spill] sm:$0xff] }
 0x260   :  { %vm7846_vm4 = vnez %v7802_v21  ;;  %v4794_v3 = vand.u32 31, %v4778_v15  ;;  %v4723_v52 = vmax.f32 %v4707_v18, 0.0  ;;  %v4688_v9 = vadd.f32 %v4590_v28, %v4151_v19  ;;  %v4592_v50 = vpop.f32.mrf.mxu1  ;;  %v5470_v30 = vld [vmem:[%s7732_s3] sm:$0xff] }
 0x261   :  { %vm4889_vm14 = vmand %vm7546_vm11, %vm7846_vm4  ;;  %vm7847_vm6 = vcmp.lt.s32.totalorder %v4795_v22, 16  ;;  %v4810_v7 = vand.u32 31, %v7366_v24  ;;  %v4813_v39 = vand.u32 31, %v7466_v47  ;;  %v4153_v25 = vadd.f32 %v7850_v60, %v3616_v35  ;;  %5220 = vmatprep.subr.mxu0 %v4724_v10  ;;  %v4631_v47 = vpop.f32.mrf.mxu0 }
 0x262   :  { %vm7592_vm9 = vmand %vm7489_vm8, %vm7847_vm6  ;;  %v4709_v8 = vadd.f32 %v7273_v32, %v4687_v33  ;;  %v4689_v48 = vadd.f32 %v4629_v0, %v4152_v62  ;;  %v4780_v22 = vshra.s32 %v7564_v36, 5  ;;  %v3617_v12 = vadd.f32 %v7852_v34, %v7851_v17  ;;  %5221 = vmatpush1.xpose.msra.mxu0 %v4723_v52  ;;  %5695 = vmatmul.mubr.msk.f32.vlgmr.msra.gmra.mxu1 %vm4884_vm2, %v7803_v6  ;;  %v4593_v15 = vpop.f32.mrf.mxu1 }
 0x263   :  { %v4710_v24 = vadd.f32 %v7273_v32, %v4688_v9  ;;  %vm7853_vm8 = vcmp.lt.s32.totalorder %v7441_v13, 16  ;;  %vm7854_vm5 = vnez %v7815_v31  ;;  %vm7623_vm6 = vcmp.eq.s32.totalorder %v4765_v53, %v5828_v4  ;;  %5698 = vmatprep.mubr.msk.f32.mxu1 %vm4889_vm14, %v7803_v6  ;;  %vm4891_vm7 = vmand %vm7592_vm9, %vm7517_vm15  ;;  %v7861_v31 = vld [vmem:[#allocation7_spill] sm:$0xff]  ;;  %v4633_v63 = vpop.f32.mrf.mxu0 }
 0x264   :  { %vm7618_vm1 = vmand %vm7854_vm5, %vm7853_vm8  ;;  %vm4845_vm3 = vcmp.lt.s32.totalorder %v4797_v11, 16  ;;  %v4690_v56 = vadd.f32 %v4631_v47, %v4153_v25  ;;  %vm7638_vm10 = vcmp.eq.s32.totalorder %v4762_v29, %v5828_v4  ;;  %vm4842_vm2 = vcmp.lt.s32.totalorder %v4794_v3, 16  ;;  %v4670_v42 = vpop.f32.mrf.mxu1  ;;  %v5704_v47 = vld [vmem:[%s7733_s4] ss:$0 sm:$0xff] }
 0x265   :  { %v4764_v13 = vshra.s32 %v7564_v36, 10  ;;  %v3618_v58 = vadd.f32 %v7862_v40, %v7861_v31  ;;  %v4154_v21 = vadd.f32 %v7863_v41, %v3617_v12  ;;  %v4726_v38 = vmax.f32 %v4710_v24, 0.0  ;;  %vm7864_vm11 = vmand %vm7577_vm0, %vm7460_vm13  ;;  %v4634_v59 = vpop.f32.mrf.mxu0 }
 0x266   :  { %v4711_v46 = vadd.f32 %v7273_v32, %v4689_v48  ;;  %v4725_v18 = vmax.f32 %v4709_v8, 0.0  ;;  %v4712_v26 = vadd.f32 %v7273_v32, %v4690_v56  ;;  %5697 = vmatmul.mubr.msk.f32.vlgmr.msra.gmra.mxu0 %vm7864_vm11, %v7803_v6  ;;  %vm7657_vm4 = vmand %vm7623_vm6, %vm4845_vm3  ;;  %vm7661_vm14 = vcmp.lt.s32.totalorder %v4813_v39, 16  ;;  %v4672_v43 = vpop.f32.mrf.mxu1  ;;  %v5706_v56 = vld [vmem:[%s7734_s5] ss:$0 sm:$0xff] }
 0x267   :  { %v4796_v1 = vand.u32 31, %v4780_v22  ;;  %v4155_v5 = vadd.f32 %v7869_v2, %v3618_v58  ;;  %v4691_v45 = vadd.f32 %v4670_v42, %v4154_v21  ;;  %5290 = vmatprep.subr.mxu1 %v4726_v38  ;;  %vm4888_vm13 = vmand %vm7618_vm1, %vm7532_vm12  ;;  %5700 = vmatprep.mubr.msk.f32.mxu0 %vm4891_vm7, %v7803_v6  ;;  %vm7683_vm3 = vcmp.lt.s32.totalorder %v4810_v7, 16 }
 0x268   :  { %v4728_v61 = vmax.f32 %v4712_v26, 0.0  ;;  %5291 = vmatpush1.xpose.msra.mxu1 %v4725_v18  ;;  %vm7679_vm0 = vmand %vm7638_vm10, %vm4842_vm2  ;;  %v4727_v44 = vmax.f32 %v4711_v46, 0.0  ;;  %v4812_v49 = vand.u32 31, %v7564_v36  ;;  %v4674_v11 = vpop.f32.mrf.mxu1  ;;  %vm4828_vm9 = vcmp.eq.s32.totalorder %v4764_v13, %v5828_v4 }
 0x269   :  { %v4692_v51 = vadd.f32 %v4672_v43, %v4155_v5  ;;  %vm4893_vm15 = vmand %vm7657_vm4, %vm7661_vm14  ;;  %v4713_v53 = vadd.f32 %v7273_v32, %v4691_v45  ;;  %vm4844_vm8 = vcmp.lt.s32.totalorder %v4796_v1, 16  ;;  %v5782_v54 = vmov 0.0  }
 0x26a   :  { %5360 = vmatprep.subr.mxu0 %v4728_v61  ;;  %vm4890_vm5 = vmand %vm7679_vm0, %vm7683_vm3  ;;  %v4675_v36 = vpop.f32.mrf.mxu1  ;;  %vm4876_vm7 = vcmp.lt.s32.totalorder %v4812_v49, 16  ;;  %vm5783_vm12 = vmmov 0   ;;  %vm5478_vm1 = vcmask 64512   ;;  %v12_v31 = vstv %s7735_s6 }
 0x26b   :  { %v4714_v27 = vadd.f32 %v7273_v32, %v4692_v51  ;;  %5361 = vmatpush1.xpose.msra.mxu0 %v4727_v44  ;;  %5699 = vmatmul.mubr.msk.f32.vlgmr.msra.gmra.mxu1 %vm4888_vm13, %v7803_v6  ;;  %vm4860_vm6 = vmand %vm4828_vm9, %vm4844_vm8  ;;  %v4729_v32 = vmax.f32 %v4713_v53, 0.0  ;;  %13 = vst [vmem:[#allocation2] sm:$0x1] %v12_v31  ;;  %vm5552_vm2 = vcmp.lt.s32.totalorder %v7066_v37, 4  ;;  %vm5587_vm11 = vcmp.eq.s32.totalorder %v7066_v37, 4 }
 0x26c   :  { %5702 = vmatprep.mubr.msk.f32.mxu1 %vm4893_vm15, %v7803_v6  ;;  %vm4892_vm10 = vmand %vm4860_vm6, %vm4876_vm7  ;;  %5710 = vmatprep.subr.mxu0 %v5782_v54 }
 0x26d   :  { %v4730_v4 = vmax.f32 %v4714_v27, 0.0 }
 0x26e   :  { %5701 = vmatmul.mubr.msk.f32.vlgmr.msra.gmra.mxu0 %vm4890_vm5, %v7803_v6 }
 0x26f   :  { %5430 = vmatprep.subr.mxu1 %v4730_v4  ;;  %5711 = vmatpush3.msra.mxu0 %v5470_v30 }
 0x270   :  { %5431 = vmatpush1.xpose.msra.mxu1 %v4729_v32  ;;  %5712 = vmatprep.mubr.msk.f32.mxu0 %vm5783_vm12, %v5782_v54 }
 0x272   :  { %v5707_v41 = vld [vmem:[#allocation2] ss:$0 sm:$0xff] }
 0x273   :  { %5703 = vmatmul.mubr.msk.f32.vlgmr.msra.gmra.mxu1 %vm4892_vm10, %v7803_v6 }
 0x315   :  { %v4976_v35 = vpop.f32.mrf.mxu0 }
 0x317   :  { %v4978_v20 = vpop.f32.mrf.mxu0 }
 0x319   :  { %v5046_v62 = vpop.f32.mrf.mxu1 }
 0x31a   :  { %v5047_v28 = vadd.f32 %v5046_v62, %v4976_v35 }
 0x31b   :  { %v5048_v10 = vpop.f32.mrf.mxu1 }
 0x31d   :  { %v5116_v3 = vpop.f32.mrf.mxu0 }
 0x31e   :  { %v5117_v9 = vadd.f32 %v5116_v3, %v5047_v28 }
 0x31f   :  { %v5118_v52 = vpop.f32.mrf.mxu0 }
 0x322   :  { %v5186_v0 = vpop.f32.mrf.mxu1 }
 0x323   :  { %v5187_v6 = vadd.f32 %v5186_v0, %v5117_v9 }
 0x324   :  { %v5188_v16 = vpop.f32.mrf.mxu1 }
 0x326   :  { %v5256_v7 = vpop.f32.mrf.mxu0 }
 0x327   :  { %v5257_v60 = vadd.f32 %v5256_v7, %v5187_v6 }
 0x328   :  { %v5258_v39 = vpop.f32.mrf.mxu0 }
 0x32b   :  { %v5326_v25 = vpop.f32.mrf.mxu1 }
 0x32c   :  { %v5327_v50 = vadd.f32 %v5326_v25, %v5257_v60 }
 0x32d   :  { %v5328_v8 = vpop.f32.mrf.mxu1 }
 0x32e   :  { %v5396_v48 = vpop.f32.mrf.mxu0 }
 0x32f   :  { %v5397_v17 = vadd.f32 %v5396_v48, %v5327_v50 }
 0x330   :  { %v5398_v22 = vpop.f32.mrf.mxu0 }
 0x333   :  { %v5466_v34 = vpop.f32.mrf.mxu1 }
 0x334   :  { %v5467_v12 = vadd.f32 %v5466_v34, %v5397_v17 }
 0x335   :  { %v5468_v24 = vpop.f32.mrf.mxu1 }
 0x336   :  { %5713 = vmatmul.mubr.msk.f32.vlgmr.msra.gmra.mxu0 %vm5478_vm1, %v5467_v12 }
 0x3f6   :  { %v5548_v55 = vpop.f32.mrf.mxu0 }
 0x3f7   :  { %v5549_v23 = vadd.f32 %v5704_v47, %v5548_v55 }
 0x3f8   :  { %v5714_v15 = vpop.f32.mrf.mxu0 }
 0x3f9   :  { %v5563_v14 = vmax.f32 %v5549_v23, 0.0  ;;  %5553 = vmax.xlane.f32.xlu1 %v5549_v23 }
 0x3fb   :  { %v5571_v13 = vmul.f32 %v5706_v56, %v5563_v14 }
 0x3fd   :  { %5572 = vadd.xlane.f32.xlu0 %v5571_v13 }
 0x482   :  { %v5554_v40 = vpop.xlane.xlu1 %5553 }
 0x483   :  { %v5555_v58 = vsub.f32 %v5549_v23, %v5554_v40 }
 0x485   :  { %v5556_v21 = vmul.f32 1.442695, %v5555_v58 }
 0x486   :  { %v5573_v38 = vpop.xlane.xlu0 %5572 }
 0x487   :  { %5754 = vpow2.f32 %v5556_v21  ;;  %v5581_v46 = vadd.f32 %v5707_v41, %v5573_v38 }
 0x489   :  { %v5582_v63 = vsub.f32 0.0, %v5581_v46 }
 0x48b   :  { %v5583_v18 = vmul.f32 1.442695, %v5582_v63 }
 0x48d   :  { %5756 = vpow2.f32 %v5583_v18 }
 0x494   :  { %v5755_v26 = vpop.eup %5754 }
 0x495   :  { %v5558_v42 = vsel %vm5552_vm2, %v5755_v26, 0.0 }
 0x496   :  { %5559 = vadd.xlane.f32.xlu1 %v5558_v42 }
 0x49a   :  { %v5757_v29 = vpop.eup %5756 }
 0x49b   :  { %v5585_v57 = vadd.f32 1.0, %v5757_v29 }
 0x49d   :  { %5758 = vrcp.f32 %v5585_v57 }
 0x4aa   :  { %v5759_v1 = vpop.eup %5758 }
 0x4ab   :  { %5590 = vperm.xlu0 %5737, %v5759_v1  }
 0x51f   :  { %v5560_v2 = vpop.xlane.xlu1 %5559 }
 0x520   :  { %5760 = vrcp.f32 %v5560_v2 }
 0x526   :  { %v5591_v5 = vpop.permute.xlu0 %5590 }
 0x527   :  { %v5593_v61 = vsel %vm5587_vm11, %v5591_v5, 0.0 }
 0x52d   :  { %v5761_v45 = vpop.eup %5760 }
 0x52e   :  { %v5562_v59 = vmul.f32 %v5761_v45, %v5558_v42 }
 0x530   :  { %v5594_v43 = vsel %vm5552_vm2, %v5562_v59, %v5593_v61 }
 0x531   :  { %5595 = vst [vmem:[%s7736_s7] sm:$0xff] %v5594_v43 }

</bundles_post_ra>
